<compile_context>
chip_gen: v7x
topology: tpu7x:2x2x1
jax: 0.10.0
libtpu: 0.0.40
codegen_flags: <defaults>
</compile_context>

<pallas_src>
import functools

import jax
import jax.numpy as jnp
from jax.experimental import pallas as pl
from jax.experimental.pallas import tpu as pltpu


# ------------------------------ fused kernel --------------------------------


def _multi_dqn_kernel(patches_ref, w1_ref, b1_ref, w2_ref, b2_ref,
                      whv_ref, bhv_ref, wha_ref, bha_ref,
                      wzv_ref, bzv_ref, wza_ref, bza_ref, q_ref,
                      *, batch, n_pos, action_space, log):
    """One grid step == one ensemble member; everything stays in VMEM."""
    f32 = jnp.float32
    bf16 = jnp.bfloat16

    # conv1 (im2col matmul) + bias + ReLU.  Rows are ordered (pos, batch).
    feat1 = jnp.dot(patches_ref[...], w1_ref[...], preferred_element_type=f32)
    feat1 = jnp.maximum(feat1 + b1_ref[...], 0.0).astype(bf16)   # (n_pos*B, 32)

    # conv2: kernel spans the whole conv1 feature map (1x1 output), so the
    # contraction over (kernel position, channel) is a per-position matmul
    # accumulation on VMEM-resident data — no reshape / transpose needed.
    cout2 = w2_ref.shape[-1]
    acc = jnp.zeros((batch, cout2), f32)
    for p in range(n_pos):                    # static unroll, tiny dots
        acc = acc + jnp.dot(feat1[p * batch:(p + 1) * batch, :], w2_ref[p],
                            preferred_element_type=f32)
    xf = jnp.maximum(acc + b2_ref[...], 0.0).astype(bf16)        # (B, conv_out)

    # Dueling head (NoisyLinear in deterministic mode == plain linear).
    hv = jnp.maximum(jnp.dot(xf, whv_ref[...], preferred_element_type=f32)
                     + bhv_ref[...], 0.0).astype(bf16)
    ha = jnp.maximum(jnp.dot(xf, wha_ref[...], preferred_element_type=f32)
                     + bha_ref[...], 0.0).astype(bf16)
    v = jnp.dot(hv, wzv_ref[...], preferred_element_type=f32) + bzv_ref[...]

    a_acts = []
    for act in range(action_space):
        a_act = (jnp.dot(ha, wza_ref[act], preferred_element_type=f32)
                 + bza_ref[act:act + 1, :])                      # (B, atoms)
        a_acts.append(a_act)
    a_mean = a_acts[0]
    for act in range(1, action_space):
        a_mean = a_mean + a_acts[act]
    a_mean = a_mean * (1.0 / action_space)

    # Dueling combine + (log_)softmax over atoms, written per action.
    for act in range(action_space):
        qa = v + a_acts[act] - a_mean                            # (B, atoms)
        m = jnp.max(qa, axis=-1, keepdims=True)
        e = jnp.exp(qa - m)
        s = jnp.sum(e, axis=-1, keepdims=True)
        if log:
            q_ref[act] = (qa - m) - jnp.log(s)
        else:
            q_ref[act] = e / s


# ------------------------------ JAX wrapper ----------------------------------


def _im2col_pos_batch(x, k):
    """Non-overlapping k x k patches (stride == kernel, pad 0) from NCHW input.

    Rows ordered (oh, ow, batch); columns ordered (cin, dy, dx) to match the
    PyTorch Conv2d weight flatten order (Cout, Cin*k*k).
    """
    B, C, H, W = x.shape
    oh, ow = H // k, W // k
    p = x.reshape(B, C, oh, k, ow, k)
    p = p.transpose(2, 4, 0, 1, 3, 5)          # (oh, ow, B, C, k, k)
    return p.reshape(oh * ow * B, C * k * k), oh, ow


def _member_spec(arr):
    """BlockSpec that squeezes the leading n_member axis (one member/grid step)."""
    nd = arr.ndim - 1

    def idx(m):
        return (m,) + (0,) * nd

    return pl.BlockSpec((None,) + arr.shape[1:], idx)


_PARAM_ORDER = ["w1", "b1", "w2", "b2", "w_hv", "b_hv", "w_ha", "b_ha",
                "w_zv", "b_zv", "w_za", "b_za"]


def multi_dqn_forward(packed, x, *, action_space, atoms, log=False):
    """Full ensemble forward in a single pallas_call (grid over members)."""
    n_member = packed["w1"].shape[0]
    batch = x.shape[0]
    k1 = 5
    patches, oh1, ow1 = _im2col_pos_batch(x, k1)
    patches = patches.astype(jnp.bfloat16)

    kk2 = packed["w2"].shape[1]                # conv2 kernel positions (k*k)
    assert oh1 == ow1 and oh1 * ow1 == kk2, (
        "kernel specialized to conv2 covering the full conv1 map (1x1 output)")
    # TODO(synk): general conv2 spatial tiling (e.g. 84x84 canonical frames,
    # batch >= 32): tile the im2col M dimension with a grid and budget
    # double-buffered tiles against v7x's 64 MiB VMEM.

    kernel = functools.partial(_multi_dqn_kernel, batch=batch, n_pos=kk2,
                               action_space=action_space, log=log)
    in_specs = ([pl.BlockSpec(patches.shape, lambda m: (0, 0))]
                + [_member_spec(packed[n]) for n in _PARAM_ORDER])
    out_specs = pl.BlockSpec((None, action_space, batch, atoms),
                             lambda m: (m, 0, 0, 0))

    q = pl.pallas_call(
        kernel,
        out_shape=jax.ShapeDtypeStruct((n_member, action_space, batch, atoms),
                                       jnp.float32),
        grid=(n_member,),
        in_specs=in_specs,
        out_specs=out_specs,
        compiler_params=pltpu.CompilerParams(
            dimension_semantics=("parallel",)),   # v7x: members split over 2 TCs
    )(patches, *[packed[n] for n in _PARAM_ORDER])

    # TODO(synk): `ensemble.forward` is not provided; assumed to apply every
    # member to x and stack the per-member q distributions on a leading axis.
    return q.transpose(0, 2, 1, 3)               # (n_member, B, A, atoms)


def pack_params(params_list):
    """Stack PyTorch-shaped member params into kernel-layout (n_member, ...)
    arrays once.  Weights -> bf16, biases stay f32 (added to f32 accumulators)."""
    bf16, f32 = jnp.bfloat16, jnp.float32
    c2o, c2i, k2, _ = params_list[0]["conv2_w"].shape
    atoms = params_list[0]["fc_z_v_w"].shape[0]
    a_atoms, hidden = params_list[0]["fc_z_a_w"].shape
    action_space = a_atoms // atoms

    def stk(fn, dtype):
        return jnp.stack([fn(p) for p in params_list], axis=0).astype(dtype)

    return {
        # conv1: (Cin*k*k, 32) matching im2col column order (cin, dy, dx)
        "w1": stk(lambda p: p["conv1_w"].reshape(p["conv1_w"].shape[0], -1).T, bf16),
        "b1": stk(lambda p: p["conv1_b"].reshape(1, -1), f32),
        # conv2: (k*k, Cin, Cout) with w2[p, c1, c2] = W[c2, c1, dy, dx], p=dy*k+dx
        "w2": stk(lambda p: p["conv2_w"].transpose(2, 3, 1, 0).reshape(k2 * k2, c2i, c2o), bf16),
        "b2": stk(lambda p: p["conv2_b"].reshape(1, -1), f32),
        # nn.Linear stores (out, in); the kernel consumes (in, out)
        "w_hv": stk(lambda p: p["fc_h_v_w"].T, bf16),
        "b_hv": stk(lambda p: p["fc_h_v_b"].reshape(1, -1), f32),
        "w_ha": stk(lambda p: p["fc_h_a_w"].T, bf16),
        "b_ha": stk(lambda p: p["fc_h_a_b"].reshape(1, -1), f32),
        "w_zv": stk(lambda p: p["fc_z_v_w"].T, bf16),
        "b_zv": stk(lambda p: p["fc_z_v_b"].reshape(1, -1), f32),
        # fc_z_a: (A*atoms, hidden) -> (A, hidden, atoms); out index m = act*atoms + z
        "w_za": stk(lambda p: p["fc_z_a_w"].reshape(action_space, atoms, hidden)
                    .transpose(0, 2, 1), bf16),
        "b_za": stk(lambda p: p["fc_z_a_b"].reshape(action_space, atoms), f32),
    }


# --------------------------- deterministic init ------------------------------


def init_member(key, history_length, conv_output_size, hidden_size,
                action_space, atoms):
    """Synthetic PyTorch-shaped parameters (NoisyLinear deterministic mu only)."""
    ks = jax.random.split(key, 12)

    def w(k, shape, fan_in):
        return jax.random.normal(k, shape, jnp.float32) / jnp.sqrt(fan_in)

    return {
        "conv1_w": w(ks[0], (32, history_length, 5, 5), history_length * 25),
        "conv1_b": w(ks[1], (32,), history_length * 25),
        "conv2_w": w(ks[2], (64, 32, 5, 5), 32 * 25),
        "conv2_b": w(ks[3], (64,), 32 * 25),
        "fc_h_v_w": w(ks[4], (hidden_size, conv_output_size), conv_output_size),
        "fc_h_v_b": w(ks[5], (hidden_size,), conv_output_size),
        "fc_h_a_w": w(ks[6], (hidden_size, conv_output_size), conv_output_size),
        "fc_h_a_b": w(ks[7], (hidden_size,), conv_output_size),
        "fc_z_v_w": w(ks[8], (atoms, hidden_size), hidden_size),
        "fc_z_v_b": w(ks[9], (atoms,), hidden_size),
        "fc_z_a_w": w(ks[10], (action_space * atoms, hidden_size), hidden_size),
        "fc_z_a_b": w(ks[11], (action_space * atoms,), hidden_size),
    }


# --------------------------------- main --------------------------------------


if __name__ == "__main__":
    # Small config ("data-efficient" architecture, shrunk spatial size).
    batch = 2
    history_length = 4
    spatial = 25            # 25 -> conv1(5,s5) -> 5 -> conv2(5,s5) -> 1
    hidden_size = 32
    action_space = 6
    atoms = 51
    n_member = 2
    conv_output_size = 64 * (spatial // 25) * (spatial // 25)    # 64*1*1 = 64

    root = jax.random.PRNGKey(0)
    k_x, *k_members = jax.random.split(root, 1 + n_member)

    params_list = [
        init_member(k, history_length, conv_output_size, hidden_size,
                    action_space, atoms)
        for k in k_members
    ]
    packed = pack_params(params_list)
    x = jax.random.normal(k_x, (batch, history_length, spatial, spatial),
                          jnp.float32)

    fwd = jax.jit(functools.partial(multi_dqn_forward,
                                    action_space=action_space, atoms=atoms,
                                    log=False))
    q = jax.block_until_ready(fwd(packed, x))

    assert q.shape == (n_member, batch, action_space, atoms), q.shape
    assert bool(jnp.all(jnp.isfinite(q)))
    # softmax over atoms should sum to ~1
    assert bool(jnp.allclose(jnp.sum(q, axis=-1), 1.0, atol=1e-4))

    # also exercise the log=True path (log_softmax over atoms)
    fwd_log = jax.jit(functools.partial(multi_dqn_forward,
                                        action_space=action_space, atoms=atoms,
                                        log=True))
    logq = jax.block_until_ready(fwd_log(packed, x))
    assert logq.shape == (n_member, batch, action_space, atoms), logq.shape
    assert bool(jnp.allclose(jnp.sum(jnp.exp(logq), axis=-1), 1.0, atol=1e-4))

    print("KERNEL_OK")
</pallas_src>

<mosaic_0001>
module attributes {stable_mosaic.version = 11 : i64} {
  func.func @_multi_dqn_kernel(%arg0: i32, %arg1: memref<50x100xbf16, #tpu.memory_space<vmem>>, %arg2: memref<1x100x32xbf16, #tpu.memory_space<vmem>>, %arg3: memref<1x1x32xf32, #tpu.memory_space<vmem>>, %arg4: memref<1x25x32x64xbf16, #tpu.memory_space<vmem>>, %arg5: memref<1x1x64xf32, #tpu.memory_space<vmem>>, %arg6: memref<1x64x32xbf16, #tpu.memory_space<vmem>>, %arg7: memref<1x1x32xf32, #tpu.memory_space<vmem>>, %arg8: memref<1x64x32xbf16, #tpu.memory_space<vmem>>, %arg9: memref<1x1x32xf32, #tpu.memory_space<vmem>>, %arg10: memref<1x32x51xbf16, #tpu.memory_space<vmem>>, %arg11: memref<1x1x51xf32, #tpu.memory_space<vmem>>, %arg12: memref<1x6x32x51xbf16, #tpu.memory_space<vmem>>, %arg13: memref<1x6x51xf32, #tpu.memory_space<vmem>>, %arg14: memref<1x6x2x51xf32, #tpu.memory_space<vmem>>) attributes {dimension_semantics = [#tpu.dimension_semantics<parallel>], iteration_bounds = array<i64: 2>, scalar_prefetch = 0 : i64, scratch_operands = 0 : i64, tpu.core_type = #tpu.core_type<tc>, window_params = [{pipeline_mode = #tpu.pipeline_mode<synchronous>, transform_indices = @transform_0, window_bounds = array<i64: 50, 100>}, {transform_indices = @transform_1, window_bounds = array<i64: 1, 100, 32>}, {transform_indices = @transform_2, window_bounds = array<i64: 1, 1, 32>}, {transform_indices = @transform_3, window_bounds = array<i64: 1, 25, 32, 64>}, {transform_indices = @transform_4, window_bounds = array<i64: 1, 1, 64>}, {transform_indices = @transform_5, window_bounds = array<i64: 1, 64, 32>}, {transform_indices = @transform_6, window_bounds = array<i64: 1, 1, 32>}, {transform_indices = @transform_7, window_bounds = array<i64: 1, 64, 32>}, {transform_indices = @transform_8, window_bounds = array<i64: 1, 1, 32>}, {transform_indices = @transform_9, window_bounds = array<i64: 1, 32, 51>}, {transform_indices = @transform_10, window_bounds = array<i64: 1, 1, 51>}, {transform_indices = @transform_11, window_bounds = array<i64: 1, 6, 32, 51>}, {transform_indices = @transform_12, window_bounds = array<i64: 1, 6, 51>}, {transform_indices = @transform_13, window_bounds = array<i64: 1, 6, 2, 51>}]} {
    %c0 = arith.constant 0 : index
    %c0_0 = arith.constant 0 : index
    %0 = vector.load %arg1[%c0, %c0_0] : memref<50x100xbf16, #tpu.memory_space<vmem>>, vector<50x100xbf16>
    %c0_1 = arith.constant 0 : index
    %c0_2 = arith.constant 0 : index
    %c0_3 = arith.constant 0 : index
    %1 = vector.load %arg2[%c0_1, %c0_2, %c0_3] : memref<1x100x32xbf16, #tpu.memory_space<vmem>>, vector<1x100x32xbf16>
    %2 = vector.shape_cast %1 : vector<1x100x32xbf16> to vector<100x32xbf16>
    %cst = arith.constant dense<0.000000e+00> : vector<50x32xf32>
    %3 = tpu.matmul %0, %2, %cst {dimension_numbers = #tpu.dot_dimension_numbers<[1], [0], [0], [1], [0, 0, 1, 1], [], []>} : vector<50x100xbf16>, vector<100x32xbf16>, vector<50x32xf32> -> vector<50x32xf32>
    %c0_4 = arith.constant 0 : index
    %c0_5 = arith.constant 0 : index
    %c0_6 = arith.constant 0 : index
    %4 = vector.load %arg3[%c0_4, %c0_5, %c0_6] : memref<1x1x32xf32, #tpu.memory_space<vmem>>, vector<1x1x32xf32>
    %5 = vector.shape_cast %4 : vector<1x1x32xf32> to vector<1x32xf32>
    %6 = vector.broadcast %5 : vector<1x32xf32> to vector<50x32xf32>
    %7 = arith.addf %3, %6 : vector<50x32xf32>
    %cst_7 = arith.constant 0.000000e+00 : f32
    %8 = vector.broadcast %cst_7 : f32 to vector<50x32xf32>
    %9 = arith.maximumf %7, %8 : vector<50x32xf32>
    %10 = arith.truncf %9 : vector<50x32xf32> to vector<50x32xbf16>
    %cst_8 = arith.constant 0.000000e+00 : f32
    %11 = vector.broadcast %cst_8 : f32 to vector<2x64xf32>
    %12 = vector.extract_strided_slice %10 {offsets = [0, 0], sizes = [2, 32], strides = [1, 1]} : vector<50x32xbf16> to vector<2x32xbf16>
    %c0_9 = arith.constant 0 : index
    %c0_10 = arith.constant 0 : index
    %c0_11 = arith.constant 0 : index
    %c0_12 = arith.constant 0 : index
    %13 = vector.load %arg4[%c0_9, %c0_10, %c0_11, %c0_12] : memref<1x25x32x64xbf16, #tpu.memory_space<vmem>>, vector<1x1x32x64xbf16>
    %14 = vector.shape_cast %13 : vector<1x1x32x64xbf16> to vector<32x64xbf16>
    %cst_13 = arith.constant dense<0.000000e+00> : vector<2x64xf32>
    %15 = tpu.matmul %12, %14, %cst_13 {dimension_numbers = #tpu.dot_dimension_numbers<[1], [0], [0], [1], [0, 0, 1, 1], [], []>} : vector<2x32xbf16>, vector<32x64xbf16>, vector<2x64xf32> -> vector<2x64xf32>
    %16 = arith.addf %11, %15 : vector<2x64xf32>
    %17 = vector.extract_strided_slice %10 {offsets = [2, 0], sizes = [2, 32], strides = [1, 1]} : vector<50x32xbf16> to vector<2x32xbf16>
    %c0_14 = arith.constant 0 : index
    %c1 = arith.constant 1 : index
    %c0_15 = arith.constant 0 : index
    %c0_16 = arith.constant 0 : index
    %18 = vector.load %arg4[%c0_14, %c1, %c0_15, %c0_16] : memref<1x25x32x64xbf16, #tpu.memory_space<vmem>>, vector<1x1x32x64xbf16>
    %19 = vector.shape_cast %18 : vector<1x1x32x64xbf16> to vector<32x64xbf16>
    %cst_17 = arith.constant dense<0.000000e+00> : vector<2x64xf32>
    %20 = tpu.matmul %17, %19, %cst_17 {dimension_numbers = #tpu.dot_dimension_numbers<[1], [0], [0], [1], [0, 0, 1, 1], [], []>} : vector<2x32xbf16>, vector<32x64xbf16>, vector<2x64xf32> -> vector<2x64xf32>
    %21 = arith.addf %16, %20 : vector<2x64xf32>
    %22 = vector.extract_strided_slice %10 {offsets = [4, 0], sizes = [2, 32], strides = [1, 1]} : vector<50x32xbf16> to vector<2x32xbf16>
    %c0_18 = arith.constant 0 : index
    %c2 = arith.constant 2 : index
    %c0_19 = arith.constant 0 : index
    %c0_20 = arith.constant 0 : index
    %23 = vector.load %arg4[%c0_18, %c2, %c0_19, %c0_20] : memref<1x25x32x64xbf16, #tpu.memory_space<vmem>>, vector<1x1x32x64xbf16>
    %24 = vector.shape_cast %23 : vector<1x1x32x64xbf16> to vector<32x64xbf16>
    %cst_21 = arith.constant dense<0.000000e+00> : vector<2x64xf32>
    %25 = tpu.matmul %22, %24, %cst_21 {dimension_numbers = #tpu.dot_dimension_numbers<[1], [0], [0], [1], [0, 0, 1, 1], [], []>} : vector<2x32xbf16>, vector<32x64xbf16>, vector<2x64xf32> -> vector<2x64xf32>
    %26 = arith.addf %21, %25 : vector<2x64xf32>
    %27 = vector.extract_strided_slice %10 {offsets = [6, 0], sizes = [2, 32], strides = [1, 1]} : vector<50x32xbf16> to vector<2x32xbf16>
    %c0_22 = arith.constant 0 : index
    %c3 = arith.constant 3 : index
    %c0_23 = arith.constant 0 : index
    %c0_24 = arith.constant 0 : index
    %28 = vector.load %arg4[%c0_22, %c3, %c0_23, %c0_24] : memref<1x25x32x64xbf16, #tpu.memory_space<vmem>>, vector<1x1x32x64xbf16>
    %29 = vector.shape_cast %28 : vector<1x1x32x64xbf16> to vector<32x64xbf16>
    %cst_25 = arith.constant dense<0.000000e+00> : vector<2x64xf32>
    %30 = tpu.matmul %27, %29, %cst_25 {dimension_numbers = #tpu.dot_dimension_numbers<[1], [0], [0], [1], [0, 0, 1, 1], [], []>} : vector<2x32xbf16>, vector<32x64xbf16>, vector<2x64xf32> -> vector<2x64xf32>
    %31 = arith.addf %26, %30 : vector<2x64xf32>
    %32 = vector.extract_strided_slice %10 {offsets = [8, 0], sizes = [2, 32], strides = [1, 1]} : vector<50x32xbf16> to vector<2x32xbf16>
    %c0_26 = arith.constant 0 : index
    %c4 = arith.constant 4 : index
    %c0_27 = arith.constant 0 : index
    %c0_28 = arith.constant 0 : index
    %33 = vector.load %arg4[%c0_26, %c4, %c0_27, %c0_28] : memref<1x25x32x64xbf16, #tpu.memory_space<vmem>>, vector<1x1x32x64xbf16>
    %34 = vector.shape_cast %33 : vector<1x1x32x64xbf16> to vector<32x64xbf16>
    %cst_29 = arith.constant dense<0.000000e+00> : vector<2x64xf32>
    %35 = tpu.matmul %32, %34, %cst_29 {dimension_numbers = #tpu.dot_dimension_numbers<[1], [0], [0], [1], [0, 0, 1, 1], [], []>} : vector<2x32xbf16>, vector<32x64xbf16>, vector<2x64xf32> -> vector<2x64xf32>
    %36 = arith.addf %31, %35 : vector<2x64xf32>
    %37 = vector.extract_strided_slice %10 {offsets = [10, 0], sizes = [2, 32], strides = [1, 1]} : vector<50x32xbf16> to vector<2x32xbf16>
    %c0_30 = arith.constant 0 : index
    %c5 = arith.constant 5 : index
    %c0_31 = arith.constant 0 : index
    %c0_32 = arith.constant 0 : index
    %38 = vector.load %arg4[%c0_30, %c5, %c0_31, %c0_32] : memref<1x25x32x64xbf16, #tpu.memory_space<vmem>>, vector<1x1x32x64xbf16>
    %39 = vector.shape_cast %38 : vector<1x1x32x64xbf16> to vector<32x64xbf16>
    %cst_33 = arith.constant dense<0.000000e+00> : vector<2x64xf32>
    %40 = tpu.matmul %37, %39, %cst_33 {dimension_numbers = #tpu.dot_dimension_numbers<[1], [0], [0], [1], [0, 0, 1, 1], [], []>} : vector<2x32xbf16>, vector<32x64xbf16>, vector<2x64xf32> -> vector<2x64xf32>
    %41 = arith.addf %36, %40 : vector<2x64xf32>
    %42 = vector.extract_strided_slice %10 {offsets = [12, 0], sizes = [2, 32], strides = [1, 1]} : vector<50x32xbf16> to vector<2x32xbf16>
    %c0_34 = arith.constant 0 : index
    %c6 = arith.constant 6 : index
    %c0_35 = arith.constant 0 : index
    %c0_36 = arith.constant 0 : index
    %43 = vector.load %arg4[%c0_34, %c6, %c0_35, %c0_36] : memref<1x25x32x64xbf16, #tpu.memory_space<vmem>>, vector<1x1x32x64xbf16>
    %44 = vector.shape_cast %43 : vector<1x1x32x64xbf16> to vector<32x64xbf16>
    %cst_37 = arith.constant dense<0.000000e+00> : vector<2x64xf32>
    %45 = tpu.matmul %42, %44, %cst_37 {dimension_numbers = #tpu.dot_dimension_numbers<[1], [0], [0], [1], [0, 0, 1, 1], [], []>} : vector<2x32xbf16>, vector<32x64xbf16>, vector<2x64xf32> -> vector<2x64xf32>
    %46 = arith.addf %41, %45 : vector<2x64xf32>
    %47 = vector.extract_strided_slice %10 {offsets = [14, 0], sizes = [2, 32], strides = [1, 1]} : vector<50x32xbf16> to vector<2x32xbf16>
    %c0_38 = arith.constant 0 : index
    %c7 = arith.constant 7 : index
    %c0_39 = arith.constant 0 : index
    %c0_40 = arith.constant 0 : index
    %48 = vector.load %arg4[%c0_38, %c7, %c0_39, %c0_40] : memref<1x25x32x64xbf16, #tpu.memory_space<vmem>>, vector<1x1x32x64xbf16>
    %49 = vector.shape_cast %48 : vector<1x1x32x64xbf16> to vector<32x64xbf16>
    %cst_41 = arith.constant dense<0.000000e+00> : vector<2x64xf32>
    %50 = tpu.matmul %47, %49, %cst_41 {dimension_numbers = #tpu.dot_dimension_numbers<[1], [0], [0], [1], [0, 0, 1, 1], [], []>} : vector<2x32xbf16>, vector<32x64xbf16>, vector<2x64xf32> -> vector<2x64xf32>
    %51 = arith.addf %46, %50 : vector<2x64xf32>
    %52 = vector.extract_strided_slice %10 {offsets = [16, 0], sizes = [2, 32], strides = [1, 1]} : vector<50x32xbf16> to vector<2x32xbf16>
    %c0_42 = arith.constant 0 : index
    %c8 = arith.constant 8 : index
    %c0_43 = arith.constant 0 : index
    %c0_44 = arith.constant 0 : index
    %53 = vector.load %arg4[%c0_42, %c8, %c0_43, %c0_44] : memref<1x25x32x64xbf16, #tpu.memory_space<vmem>>, vector<1x1x32x64xbf16>
    %54 = vector.shape_cast %53 : vector<1x1x32x64xbf16> to vector<32x64xbf16>
    %cst_45 = arith.constant dense<0.000000e+00> : vector<2x64xf32>
    %55 = tpu.matmul %52, %54, %cst_45 {dimension_numbers = #tpu.dot_dimension_numbers<[1], [0], [0], [1], [0, 0, 1, 1], [], []>} : vector<2x32xbf16>, vector<32x64xbf16>, vector<2x64xf32> -> vector<2x64xf32>
    %56 = arith.addf %51, %55 : vector<2x64xf32>
    %57 = vector.extract_strided_slice %10 {offsets = [18, 0], sizes = [2, 32], strides = [1, 1]} : vector<50x32xbf16> to vector<2x32xbf16>
    %c0_46 = arith.constant 0 : index
    %c9 = arith.constant 9 : index
    %c0_47 = arith.constant 0 : index
    %c0_48 = arith.constant 0 : index
    %58 = vector.load %arg4[%c0_46, %c9, %c0_47, %c0_48] : memref<1x25x32x64xbf16, #tpu.memory_space<vmem>>, vector<1x1x32x64xbf16>
    %59 = vector.shape_cast %58 : vector<1x1x32x64xbf16> to vector<32x64xbf16>
    %cst_49 = arith.constant dense<0.000000e+00> : vector<2x64xf32>
    %60 = tpu.matmul %57, %59, %cst_49 {dimension_numbers = #tpu.dot_dimension_numbers<[1], [0], [0], [1], [0, 0, 1, 1], [], []>} : vector<2x32xbf16>, vector<32x64xbf16>, vector<2x64xf32> -> vector<2x64xf32>
    %61 = arith.addf %56, %60 : vector<2x64xf32>
    %62 = vector.extract_strided_slice %10 {offsets = [20, 0], sizes = [2, 32], strides = [1, 1]} : vector<50x32xbf16> to vector<2x32xbf16>
    %c0_50 = arith.constant 0 : index
    %c10 = arith.constant 10 : index
    %c0_51 = arith.constant 0 : index
    %c0_52 = arith.constant 0 : index
    %63 = vector.load %arg4[%c0_50, %c10, %c0_51, %c0_52] : memref<1x25x32x64xbf16, #tpu.memory_space<vmem>>, vector<1x1x32x64xbf16>
    %64 = vector.shape_cast %63 : vector<1x1x32x64xbf16> to vector<32x64xbf16>
    %cst_53 = arith.constant dense<0.000000e+00> : vector<2x64xf32>
    %65 = tpu.matmul %62, %64, %cst_53 {dimension_numbers = #tpu.dot_dimension_numbers<[1], [0], [0], [1], [0, 0, 1, 1], [], []>} : vector<2x32xbf16>, vector<32x64xbf16>, vector<2x64xf32> -> vector<2x64xf32>
    %66 = arith.addf %61, %65 : vector<2x64xf32>
    %67 = vector.extract_strided_slice %10 {offsets = [22, 0], sizes = [2, 32], strides = [1, 1]} : vector<50x32xbf16> to vector<2x32xbf16>
    %c0_54 = arith.constant 0 : index
    %c11 = arith.constant 11 : index
    %c0_55 = arith.constant 0 : index
    %c0_56 = arith.constant 0 : index
    %68 = vector.load %arg4[%c0_54, %c11, %c0_55, %c0_56] : memref<1x25x32x64xbf16, #tpu.memory_space<vmem>>, vector<1x1x32x64xbf16>
    %69 = vector.shape_cast %68 : vector<1x1x32x64xbf16> to vector<32x64xbf16>
    %cst_57 = arith.constant dense<0.000000e+00> : vector<2x64xf32>
    %70 = tpu.matmul %67, %69, %cst_57 {dimension_numbers = #tpu.dot_dimension_numbers<[1], [0], [0], [1], [0, 0, 1, 1], [], []>} : vector<2x32xbf16>, vector<32x64xbf16>, vector<2x64xf32> -> vector<2x64xf32>
    %71 = arith.addf %66, %70 : vector<2x64xf32>
    %72 = vector.extract_strided_slice %10 {offsets = [24, 0], sizes = [2, 32], strides = [1, 1]} : vector<50x32xbf16> to vector<2x32xbf16>
    %c0_58 = arith.constant 0 : index
    %c12 = arith.constant 12 : index
    %c0_59 = arith.constant 0 : index
    %c0_60 = arith.constant 0 : index
    %73 = vector.load %arg4[%c0_58, %c12, %c0_59, %c0_60] : memref<1x25x32x64xbf16, #tpu.memory_space<vmem>>, vector<1x1x32x64xbf16>
    %74 = vector.shape_cast %73 : vector<1x1x32x64xbf16> to vector<32x64xbf16>
    %cst_61 = arith.constant dense<0.000000e+00> : vector<2x64xf32>
    %75 = tpu.matmul %72, %74, %cst_61 {dimension_numbers = #tpu.dot_dimension_numbers<[1], [0], [0], [1], [0, 0, 1, 1], [], []>} : vector<2x32xbf16>, vector<32x64xbf16>, vector<2x64xf32> -> vector<2x64xf32>
    %76 = arith.addf %71, %75 : vector<2x64xf32>
    %77 = vector.extract_strided_slice %10 {offsets = [26, 0], sizes = [2, 32], strides = [1, 1]} : vector<50x32xbf16> to vector<2x32xbf16>
    %c0_62 = arith.constant 0 : index
    %c13 = arith.constant 13 : index
    %c0_63 = arith.constant 0 : index
    %c0_64 = arith.constant 0 : index
    %78 = vector.load %arg4[%c0_62, %c13, %c0_63, %c0_64] : memref<1x25x32x64xbf16, #tpu.memory_space<vmem>>, vector<1x1x32x64xbf16>
    %79 = vector.shape_cast %78 : vector<1x1x32x64xbf16> to vector<32x64xbf16>
    %cst_65 = arith.constant dense<0.000000e+00> : vector<2x64xf32>
    %80 = tpu.matmul %77, %79, %cst_65 {dimension_numbers = #tpu.dot_dimension_numbers<[1], [0], [0], [1], [0, 0, 1, 1], [], []>} : vector<2x32xbf16>, vector<32x64xbf16>, vector<2x64xf32> -> vector<2x64xf32>
    %81 = arith.addf %76, %80 : vector<2x64xf32>
    %82 = vector.extract_strided_slice %10 {offsets = [28, 0], sizes = [2, 32], strides = [1, 1]} : vector<50x32xbf16> to vector<2x32xbf16>
    %c0_66 = arith.constant 0 : index
    %c14 = arith.constant 14 : index
    %c0_67 = arith.constant 0 : index
    %c0_68 = arith.constant 0 : index
    %83 = vector.load %arg4[%c0_66, %c14, %c0_67, %c0_68] : memref<1x25x32x64xbf16, #tpu.memory_space<vmem>>, vector<1x1x32x64xbf16>
    %84 = vector.shape_cast %83 : vector<1x1x32x64xbf16> to vector<32x64xbf16>
    %cst_69 = arith.constant dense<0.000000e+00> : vector<2x64xf32>
    %85 = tpu.matmul %82, %84, %cst_69 {dimension_numbers = #tpu.dot_dimension_numbers<[1], [0], [0], [1], [0, 0, 1, 1], [], []>} : vector<2x32xbf16>, vector<32x64xbf16>, vector<2x64xf32> -> vector<2x64xf32>
    %86 = arith.addf %81, %85 : vector<2x64xf32>
    %87 = vector.extract_strided_slice %10 {offsets = [30, 0], sizes = [2, 32], strides = [1, 1]} : vector<50x32xbf16> to vector<2x32xbf16>
    %c0_70 = arith.constant 0 : index
    %c15 = arith.constant 15 : index
    %c0_71 = arith.constant 0 : index
    %c0_72 = arith.constant 0 : index
    %88 = vector.load %arg4[%c0_70, %c15, %c0_71, %c0_72] : memref<1x25x32x64xbf16, #tpu.memory_space<vmem>>, vector<1x1x32x64xbf16>
    %89 = vector.shape_cast %88 : vector<1x1x32x64xbf16> to vector<32x64xbf16>
    %cst_73 = arith.constant dense<0.000000e+00> : vector<2x64xf32>
    %90 = tpu.matmul %87, %89, %cst_73 {dimension_numbers = #tpu.dot_dimension_numbers<[1], [0], [0], [1], [0, 0, 1, 1], [], []>} : vector<2x32xbf16>, vector<32x64xbf16>, vector<2x64xf32> -> vector<2x64xf32>
    %91 = arith.addf %86, %90 : vector<2x64xf32>
    %92 = vector.extract_strided_slice %10 {offsets = [32, 0], sizes = [2, 32], strides = [1, 1]} : vector<50x32xbf16> to vector<2x32xbf16>
    %c0_74 = arith.constant 0 : index
    %c16 = arith.constant 16 : index
    %c0_75 = arith.constant 0 : index
    %c0_76 = arith.constant 0 : index
    %93 = vector.load %arg4[%c0_74, %c16, %c0_75, %c0_76] : memref<1x25x32x64xbf16, #tpu.memory_space<vmem>>, vector<1x1x32x64xbf16>
    %94 = vector.shape_cast %93 : vector<1x1x32x64xbf16> to vector<32x64xbf16>
    %cst_77 = arith.constant dense<0.000000e+00> : vector<2x64xf32>
    %95 = tpu.matmul %92, %94, %cst_77 {dimension_numbers = #tpu.dot_dimension_numbers<[1], [0], [0], [1], [0, 0, 1, 1], [], []>} : vector<2x32xbf16>, vector<32x64xbf16>, vector<2x64xf32> -> vector<2x64xf32>
    %96 = arith.addf %91, %95 : vector<2x64xf32>
    %97 = vector.extract_strided_slice %10 {offsets = [34, 0], sizes = [2, 32], strides = [1, 1]} : vector<50x32xbf16> to vector<2x32xbf16>
    %c0_78 = arith.constant 0 : index
    %c17 = arith.constant 17 : index
    %c0_79 = arith.constant 0 : index
    %c0_80 = arith.constant 0 : index
    %98 = vector.load %arg4[%c0_78, %c17, %c0_79, %c0_80] : memref<1x25x32x64xbf16, #tpu.memory_space<vmem>>, vector<1x1x32x64xbf16>
    %99 = vector.shape_cast %98 : vector<1x1x32x64xbf16> to vector<32x64xbf16>
    %cst_81 = arith.constant dense<0.000000e+00> : vector<2x64xf32>
    %100 = tpu.matmul %97, %99, %cst_81 {dimension_numbers = #tpu.dot_dimension_numbers<[1], [0], [0], [1], [0, 0, 1, 1], [], []>} : vector<2x32xbf16>, vector<32x64xbf16>, vector<2x64xf32> -> vector<2x64xf32>
    %101 = arith.addf %96, %100 : vector<2x64xf32>
    %102 = vector.extract_strided_slice %10 {offsets = [36, 0], sizes = [2, 32], strides = [1, 1]} : vector<50x32xbf16> to vector<2x32xbf16>
    %c0_82 = arith.constant 0 : index
    %c18 = arith.constant 18 : index
    %c0_83 = arith.constant 0 : index
    %c0_84 = arith.constant 0 : index
    %103 = vector.load %arg4[%c0_82, %c18, %c0_83, %c0_84] : memref<1x25x32x64xbf16, #tpu.memory_space<vmem>>, vector<1x1x32x64xbf16>
    %104 = vector.shape_cast %103 : vector<1x1x32x64xbf16> to vector<32x64xbf16>
    %cst_85 = arith.constant dense<0.000000e+00> : vector<2x64xf32>
    %105 = tpu.matmul %102, %104, %cst_85 {dimension_numbers = #tpu.dot_dimension_numbers<[1], [0], [0], [1], [0, 0, 1, 1], [], []>} : vector<2x32xbf16>, vector<32x64xbf16>, vector<2x64xf32> -> vector<2x64xf32>
    %106 = arith.addf %101, %105 : vector<2x64xf32>
    %107 = vector.extract_strided_slice %10 {offsets = [38, 0], sizes = [2, 32], strides = [1, 1]} : vector<50x32xbf16> to vector<2x32xbf16>
    %c0_86 = arith.constant 0 : index
    %c19 = arith.constant 19 : index
    %c0_87 = arith.constant 0 : index
    %c0_88 = arith.constant 0 : index
    %108 = vector.load %arg4[%c0_86, %c19, %c0_87, %c0_88] : memref<1x25x32x64xbf16, #tpu.memory_space<vmem>>, vector<1x1x32x64xbf16>
    %109 = vector.shape_cast %108 : vector<1x1x32x64xbf16> to vector<32x64xbf16>
    %cst_89 = arith.constant dense<0.000000e+00> : vector<2x64xf32>
    %110 = tpu.matmul %107, %109, %cst_89 {dimension_numbers = #tpu.dot_dimension_numbers<[1], [0], [0], [1], [0, 0, 1, 1], [], []>} : vector<2x32xbf16>, vector<32x64xbf16>, vector<2x64xf32> -> vector<2x64xf32>
    %111 = arith.addf %106, %110 : vector<2x64xf32>
    %112 = vector.extract_strided_slice %10 {offsets = [40, 0], sizes = [2, 32], strides = [1, 1]} : vector<50x32xbf16> to vector<2x32xbf16>
    %c0_90 = arith.constant 0 : index
    %c20 = arith.constant 20 : index
    %c0_91 = arith.constant 0 : index
    %c0_92 = arith.constant 0 : index
    %113 = vector.load %arg4[%c0_90, %c20, %c0_91, %c0_92] : memref<1x25x32x64xbf16, #tpu.memory_space<vmem>>, vector<1x1x32x64xbf16>
    %114 = vector.shape_cast %113 : vector<1x1x32x64xbf16> to vector<32x64xbf16>
    %cst_93 = arith.constant dense<0.000000e+00> : vector<2x64xf32>
    %115 = tpu.matmul %112, %114, %cst_93 {dimension_numbers = #tpu.dot_dimension_numbers<[1], [0], [0], [1], [0, 0, 1, 1], [], []>} : vector<2x32xbf16>, vector<32x64xbf16>, vector<2x64xf32> -> vector<2x64xf32>
    %116 = arith.addf %111, %115 : vector<2x64xf32>
    %117 = vector.extract_strided_slice %10 {offsets = [42, 0], sizes = [2, 32], strides = [1, 1]} : vector<50x32xbf16> to vector<2x32xbf16>
    %c0_94 = arith.constant 0 : index
    %c21 = arith.constant 21 : index
    %c0_95 = arith.constant 0 : index
    %c0_96 = arith.constant 0 : index
    %118 = vector.load %arg4[%c0_94, %c21, %c0_95, %c0_96] : memref<1x25x32x64xbf16, #tpu.memory_space<vmem>>, vector<1x1x32x64xbf16>
    %119 = vector.shape_cast %118 : vector<1x1x32x64xbf16> to vector<32x64xbf16>
    %cst_97 = arith.constant dense<0.000000e+00> : vector<2x64xf32>
    %120 = tpu.matmul %117, %119, %cst_97 {dimension_numbers = #tpu.dot_dimension_numbers<[1], [0], [0], [1], [0, 0, 1, 1], [], []>} : vector<2x32xbf16>, vector<32x64xbf16>, vector<2x64xf32> -> vector<2x64xf32>
    %121 = arith.addf %116, %120 : vector<2x64xf32>
    %122 = vector.extract_strided_slice %10 {offsets = [44, 0], sizes = [2, 32], strides = [1, 1]} : vector<50x32xbf16> to vector<2x32xbf16>
    %c0_98 = arith.constant 0 : index
    %c22 = arith.constant 22 : index
    %c0_99 = arith.constant 0 : index
    %c0_100 = arith.constant 0 : index
    %123 = vector.load %arg4[%c0_98, %c22, %c0_99, %c0_100] : memref<1x25x32x64xbf16, #tpu.memory_space<vmem>>, vector<1x1x32x64xbf16>
    %124 = vector.shape_cast %123 : vector<1x1x32x64xbf16> to vector<32x64xbf16>
    %cst_101 = arith.constant dense<0.000000e+00> : vector<2x64xf32>
    %125 = tpu.matmul %122, %124, %cst_101 {dimension_numbers = #tpu.dot_dimension_numbers<[1], [0], [0], [1], [0, 0, 1, 1], [], []>} : vector<2x32xbf16>, vector<32x64xbf16>, vector<2x64xf32> -> vector<2x64xf32>
    %126 = arith.addf %121, %125 : vector<2x64xf32>
    %127 = vector.extract_strided_slice %10 {offsets = [46, 0], sizes = [2, 32], strides = [1, 1]} : vector<50x32xbf16> to vector<2x32xbf16>
    %c0_102 = arith.constant 0 : index
    %c23 = arith.constant 23 : index
    %c0_103 = arith.constant 0 : index
    %c0_104 = arith.constant 0 : index
    %128 = vector.load %arg4[%c0_102, %c23, %c0_103, %c0_104] : memref<1x25x32x64xbf16, #tpu.memory_space<vmem>>, vector<1x1x32x64xbf16>
    %129 = vector.shape_cast %128 : vector<1x1x32x64xbf16> to vector<32x64xbf16>
    %cst_105 = arith.constant dense<0.000000e+00> : vector<2x64xf32>
    %130 = tpu.matmul %127, %129, %cst_105 {dimension_numbers = #tpu.dot_dimension_numbers<[1], [0], [0], [1], [0, 0, 1, 1], [], []>} : vector<2x32xbf16>, vector<32x64xbf16>, vector<2x64xf32> -> vector<2x64xf32>
    %131 = arith.addf %126, %130 : vector<2x64xf32>
    %132 = vector.extract_strided_slice %10 {offsets = [48, 0], sizes = [2, 32], strides = [1, 1]} : vector<50x32xbf16> to vector<2x32xbf16>
    %c0_106 = arith.constant 0 : index
    %c24 = arith.constant 24 : index
    %c0_107 = arith.constant 0 : index
    %c0_108 = arith.constant 0 : index
    %133 = vector.load %arg4[%c0_106, %c24, %c0_107, %c0_108] : memref<1x25x32x64xbf16, #tpu.memory_space<vmem>>, vector<1x1x32x64xbf16>
    %134 = vector.shape_cast %133 : vector<1x1x32x64xbf16> to vector<32x64xbf16>
    %cst_109 = arith.constant dense<0.000000e+00> : vector<2x64xf32>
    %135 = tpu.matmul %132, %134, %cst_109 {dimension_numbers = #tpu.dot_dimension_numbers<[1], [0], [0], [1], [0, 0, 1, 1], [], []>} : vector<2x32xbf16>, vector<32x64xbf16>, vector<2x64xf32> -> vector<2x64xf32>
    %136 = arith.addf %131, %135 : vector<2x64xf32>
    %c0_110 = arith.constant 0 : index
    %c0_111 = arith.constant 0 : index
    %c0_112 = arith.constant 0 : index
    %137 = vector.load %arg5[%c0_110, %c0_111, %c0_112] : memref<1x1x64xf32, #tpu.memory_space<vmem>>, vector<1x1x64xf32>
    %138 = vector.shape_cast %137 : vector<1x1x64xf32> to vector<1x64xf32>
    %139 = vector.broadcast %138 : vector<1x64xf32> to vector<2x64xf32>
    %140 = arith.addf %136, %139 : vector<2x64xf32>
    %cst_113 = arith.constant 0.000000e+00 : f32
    %141 = vector.broadcast %cst_113 : f32 to vector<2x64xf32>
    %142 = arith.maximumf %140, %141 : vector<2x64xf32>
    %143 = arith.truncf %142 : vector<2x64xf32> to vector<2x64xbf16>
    %c0_114 = arith.constant 0 : index
    %c0_115 = arith.constant 0 : index
    %c0_116 = arith.constant 0 : index
    %144 = vector.load %arg6[%c0_114, %c0_115, %c0_116] : memref<1x64x32xbf16, #tpu.memory_space<vmem>>, vector<1x64x32xbf16>
    %145 = vector.shape_cast %144 : vector<1x64x32xbf16> to vector<64x32xbf16>
    %cst_117 = arith.constant dense<0.000000e+00> : vector<2x32xf32>
    %146 = tpu.matmul %143, %145, %cst_117 {dimension_numbers = #tpu.dot_dimension_numbers<[1], [0], [0], [1], [0, 0, 1, 1], [], []>} : vector<2x64xbf16>, vector<64x32xbf16>, vector<2x32xf32> -> vector<2x32xf32>
    %c0_118 = arith.constant 0 : index
    %c0_119 = arith.constant 0 : index
    %c0_120 = arith.constant 0 : index
    %147 = vector.load %arg7[%c0_118, %c0_119, %c0_120] : memref<1x1x32xf32, #tpu.memory_space<vmem>>, vector<1x1x32xf32>
    %148 = vector.shape_cast %147 : vector<1x1x32xf32> to vector<1x32xf32>
    %149 = vector.broadcast %148 : vector<1x32xf32> to vector<2x32xf32>
    %150 = arith.addf %146, %149 : vector<2x32xf32>
    %cst_121 = arith.constant 0.000000e+00 : f32
    %151 = vector.broadcast %cst_121 : f32 to vector<2x32xf32>
    %152 = arith.maximumf %150, %151 : vector<2x32xf32>
    %153 = arith.truncf %152 : vector<2x32xf32> to vector<2x32xbf16>
    %c0_122 = arith.constant 0 : index
    %c0_123 = arith.constant 0 : index
    %c0_124 = arith.constant 0 : index
    %154 = vector.load %arg8[%c0_122, %c0_123, %c0_124] : memref<1x64x32xbf16, #tpu.memory_space<vmem>>, vector<1x64x32xbf16>
    %155 = vector.shape_cast %154 : vector<1x64x32xbf16> to vector<64x32xbf16>
    %cst_125 = arith.constant dense<0.000000e+00> : vector<2x32xf32>
    %156 = tpu.matmul %143, %155, %cst_125 {dimension_numbers = #tpu.dot_dimension_numbers<[1], [0], [0], [1], [0, 0, 1, 1], [], []>} : vector<2x64xbf16>, vector<64x32xbf16>, vector<2x32xf32> -> vector<2x32xf32>
    %c0_126 = arith.constant 0 : index
    %c0_127 = arith.constant 0 : index
    %c0_128 = arith.constant 0 : index
    %157 = vector.load %arg9[%c0_126, %c0_127, %c0_128] : memref<1x1x32xf32, #tpu.memory_space<vmem>>, vector<1x1x32xf32>
    %158 = vector.shape_cast %157 : vector<1x1x32xf32> to vector<1x32xf32>
    %159 = vector.broadcast %158 : vector<1x32xf32> to vector<2x32xf32>
    %160 = arith.addf %156, %159 : vector<2x32xf32>
    %cst_129 = arith.constant 0.000000e+00 : f32
    %161 = vector.broadcast %cst_129 : f32 to vector<2x32xf32>
    %162 = arith.maximumf %160, %161 : vector<2x32xf32>
    %163 = arith.truncf %162 : vector<2x32xf32> to vector<2x32xbf16>
    %c0_130 = arith.constant 0 : index
    %c0_131 = arith.constant 0 : index
    %c0_132 = arith.constant 0 : index
    %164 = vector.load %arg10[%c0_130, %c0_131, %c0_132] : memref<1x32x51xbf16, #tpu.memory_space<vmem>>, vector<1x32x51xbf16>
    %165 = vector.shape_cast %164 : vector<1x32x51xbf16> to vector<32x51xbf16>
    %cst_133 = arith.constant dense<0.000000e+00> : vector<2x51xf32>
    %166 = tpu.matmul %153, %165, %cst_133 {dimension_numbers = #tpu.dot_dimension_numbers<[1], [0], [0], [1], [0, 0, 1, 1], [], []>} : vector<2x32xbf16>, vector<32x51xbf16>, vector<2x51xf32> -> vector<2x51xf32>
    %c0_134 = arith.constant 0 : index
    %c0_135 = arith.constant 0 : index
    %c0_136 = arith.constant 0 : index
    %167 = vector.load %arg11[%c0_134, %c0_135, %c0_136] : memref<1x1x51xf32, #tpu.memory_space<vmem>>, vector<1x1x51xf32>
    %168 = vector.shape_cast %167 : vector<1x1x51xf32> to vector<1x51xf32>
    %169 = vector.broadcast %168 : vector<1x51xf32> to vector<2x51xf32>
    %170 = arith.addf %166, %169 : vector<2x51xf32>
    %c0_137 = arith.constant 0 : index
    %c0_138 = arith.constant 0 : index
    %c0_139 = arith.constant 0 : index
    %c0_140 = arith.constant 0 : index
    %171 = vector.load %arg12[%c0_137, %c0_138, %c0_139, %c0_140] : memref<1x6x32x51xbf16, #tpu.memory_space<vmem>>, vector<1x1x32x51xbf16>
    %172 = vector.shape_cast %171 : vector<1x1x32x51xbf16> to vector<32x51xbf16>
    %cst_141 = arith.constant dense<0.000000e+00> : vector<2x51xf32>
    %173 = tpu.matmul %163, %172, %cst_141 {dimension_numbers = #tpu.dot_dimension_numbers<[1], [0], [0], [1], [0, 0, 1, 1], [], []>} : vector<2x32xbf16>, vector<32x51xbf16>, vector<2x51xf32> -> vector<2x51xf32>
    %c0_142 = arith.constant 0 : index
    %c0_143 = arith.constant 0 : index
    %c0_144 = arith.constant 0 : index
    %174 = vector.load %arg13[%c0_142, %c0_143, %c0_144] : memref<1x6x51xf32, #tpu.memory_space<vmem>>, vector<1x1x51xf32>
    %175 = vector.shape_cast %174 : vector<1x1x51xf32> to vector<1x51xf32>
    %176 = vector.broadcast %175 : vector<1x51xf32> to vector<2x51xf32>
    %177 = arith.addf %173, %176 : vector<2x51xf32>
    %c0_145 = arith.constant 0 : index
    %c1_146 = arith.constant 1 : index
    %c0_147 = arith.constant 0 : index
    %c0_148 = arith.constant 0 : index
    %178 = vector.load %arg12[%c0_145, %c1_146, %c0_147, %c0_148] : memref<1x6x32x51xbf16, #tpu.memory_space<vmem>>, vector<1x1x32x51xbf16>
    %179 = vector.shape_cast %178 : vector<1x1x32x51xbf16> to vector<32x51xbf16>
    %cst_149 = arith.constant dense<0.000000e+00> : vector<2x51xf32>
    %180 = tpu.matmul %163, %179, %cst_149 {dimension_numbers = #tpu.dot_dimension_numbers<[1], [0], [0], [1], [0, 0, 1, 1], [], []>} : vector<2x32xbf16>, vector<32x51xbf16>, vector<2x51xf32> -> vector<2x51xf32>
    %c0_150 = arith.constant 0 : index
    %c1_151 = arith.constant 1 : index
    %c0_152 = arith.constant 0 : index
    %181 = vector.load %arg13[%c0_150, %c1_151, %c0_152] : memref<1x6x51xf32, #tpu.memory_space<vmem>>, vector<1x1x51xf32>
    %182 = vector.shape_cast %181 : vector<1x1x51xf32> to vector<1x51xf32>
    %183 = vector.broadcast %182 : vector<1x51xf32> to vector<2x51xf32>
    %184 = arith.addf %180, %183 : vector<2x51xf32>
    %c0_153 = arith.constant 0 : index
    %c2_154 = arith.constant 2 : index
    %c0_155 = arith.constant 0 : index
    %c0_156 = arith.constant 0 : index
    %185 = vector.load %arg12[%c0_153, %c2_154, %c0_155, %c0_156] : memref<1x6x32x51xbf16, #tpu.memory_space<vmem>>, vector<1x1x32x51xbf16>
    %186 = vector.shape_cast %185 : vector<1x1x32x51xbf16> to vector<32x51xbf16>
    %cst_157 = arith.constant dense<0.000000e+00> : vector<2x51xf32>
    %187 = tpu.matmul %163, %186, %cst_157 {dimension_numbers = #tpu.dot_dimension_numbers<[1], [0], [0], [1], [0, 0, 1, 1], [], []>} : vector<2x32xbf16>, vector<32x51xbf16>, vector<2x51xf32> -> vector<2x51xf32>
    %c0_158 = arith.constant 0 : index
    %c2_159 = arith.constant 2 : index
    %c0_160 = arith.constant 0 : index
    %188 = vector.load %arg13[%c0_158, %c2_159, %c0_160] : memref<1x6x51xf32, #tpu.memory_space<vmem>>, vector<1x1x51xf32>
    %189 = vector.shape_cast %188 : vector<1x1x51xf32> to vector<1x51xf32>
    %190 = vector.broadcast %189 : vector<1x51xf32> to vector<2x51xf32>
    %191 = arith.addf %187, %190 : vector<2x51xf32>
    %c0_161 = arith.constant 0 : index
    %c3_162 = arith.constant 3 : index
    %c0_163 = arith.constant 0 : index
    %c0_164 = arith.constant 0 : index
    %192 = vector.load %arg12[%c0_161, %c3_162, %c0_163, %c0_164] : memref<1x6x32x51xbf16, #tpu.memory_space<vmem>>, vector<1x1x32x51xbf16>
    %193 = vector.shape_cast %192 : vector<1x1x32x51xbf16> to vector<32x51xbf16>
    %cst_165 = arith.constant dense<0.000000e+00> : vector<2x51xf32>
    %194 = tpu.matmul %163, %193, %cst_165 {dimension_numbers = #tpu.dot_dimension_numbers<[1], [0], [0], [1], [0, 0, 1, 1], [], []>} : vector<2x32xbf16>, vector<32x51xbf16>, vector<2x51xf32> -> vector<2x51xf32>
    %c0_166 = arith.constant 0 : index
    %c3_167 = arith.constant 3 : index
    %c0_168 = arith.constant 0 : index
    %195 = vector.load %arg13[%c0_166, %c3_167, %c0_168] : memref<1x6x51xf32, #tpu.memory_space<vmem>>, vector<1x1x51xf32>
    %196 = vector.shape_cast %195 : vector<1x1x51xf32> to vector<1x51xf32>
    %197 = vector.broadcast %196 : vector<1x51xf32> to vector<2x51xf32>
    %198 = arith.addf %194, %197 : vector<2x51xf32>
    %c0_169 = arith.constant 0 : index
    %c4_170 = arith.constant 4 : index
    %c0_171 = arith.constant 0 : index
    %c0_172 = arith.constant 0 : index
    %199 = vector.load %arg12[%c0_169, %c4_170, %c0_171, %c0_172] : memref<1x6x32x51xbf16, #tpu.memory_space<vmem>>, vector<1x1x32x51xbf16>
    %200 = vector.shape_cast %199 : vector<1x1x32x51xbf16> to vector<32x51xbf16>
    %cst_173 = arith.constant dense<0.000000e+00> : vector<2x51xf32>
    %201 = tpu.matmul %163, %200, %cst_173 {dimension_numbers = #tpu.dot_dimension_numbers<[1], [0], [0], [1], [0, 0, 1, 1], [], []>} : vector<2x32xbf16>, vector<32x51xbf16>, vector<2x51xf32> -> vector<2x51xf32>
    %c0_174 = arith.constant 0 : index
    %c4_175 = arith.constant 4 : index
    %c0_176 = arith.constant 0 : index
    %202 = vector.load %arg13[%c0_174, %c4_175, %c0_176] : memref<1x6x51xf32, #tpu.memory_space<vmem>>, vector<1x1x51xf32>
    %203 = vector.shape_cast %202 : vector<1x1x51xf32> to vector<1x51xf32>
    %204 = vector.broadcast %203 : vector<1x51xf32> to vector<2x51xf32>
    %205 = arith.addf %201, %204 : vector<2x51xf32>
    %c0_177 = arith.constant 0 : index
    %c5_178 = arith.constant 5 : index
    %c0_179 = arith.constant 0 : index
    %c0_180 = arith.constant 0 : index
    %206 = vector.load %arg12[%c0_177, %c5_178, %c0_179, %c0_180] : memref<1x6x32x51xbf16, #tpu.memory_space<vmem>>, vector<1x1x32x51xbf16>
    %207 = vector.shape_cast %206 : vector<1x1x32x51xbf16> to vector<32x51xbf16>
    %cst_181 = arith.constant dense<0.000000e+00> : vector<2x51xf32>
    %208 = tpu.matmul %163, %207, %cst_181 {dimension_numbers = #tpu.dot_dimension_numbers<[1], [0], [0], [1], [0, 0, 1, 1], [], []>} : vector<2x32xbf16>, vector<32x51xbf16>, vector<2x51xf32> -> vector<2x51xf32>
    %c0_182 = arith.constant 0 : index
    %c5_183 = arith.constant 5 : index
    %c0_184 = arith.constant 0 : index
    %209 = vector.load %arg13[%c0_182, %c5_183, %c0_184] : memref<1x6x51xf32, #tpu.memory_space<vmem>>, vector<1x1x51xf32>
    %210 = vector.shape_cast %209 : vector<1x1x51xf32> to vector<1x51xf32>
    %211 = vector.broadcast %210 : vector<1x51xf32> to vector<2x51xf32>
    %212 = arith.addf %208, %211 : vector<2x51xf32>
    %213 = arith.addf %177, %184 : vector<2x51xf32>
    %214 = arith.addf %213, %191 : vector<2x51xf32>
    %215 = arith.addf %214, %198 : vector<2x51xf32>
    %216 = arith.addf %215, %205 : vector<2x51xf32>
    %217 = arith.addf %216, %212 : vector<2x51xf32>
    %cst_185 = arith.constant 0.166666672 : f32
    %218 = vector.broadcast %cst_185 : f32 to vector<2x51xf32>
    %219 = arith.mulf %217, %218 : vector<2x51xf32>
    %220 = arith.addf %170, %177 : vector<2x51xf32>
    %221 = arith.subf %220, %219 : vector<2x51xf32>
    %cst_186 = arith.constant dense<0xFF800000> : vector<2xf32>
    %222 = vector.multi_reduction <maximumf>, %221, %cst_186 [1] : vector<2x51xf32> to vector<2xf32>
    %223 = vector.shape_cast %222 : vector<2xf32> to vector<2x1xf32>
    %224 = vector.broadcast %223 : vector<2x1xf32> to vector<2x51xf32>
    %225 = arith.subf %221, %224 : vector<2x51xf32>
    %226 = math.exp %225 : vector<2x51xf32>
    %cst_187 = arith.constant dense<0.000000e+00> : vector<2xf32>
    %227 = vector.multi_reduction <add>, %226, %cst_187 [1] : vector<2x51xf32> to vector<2xf32>
    %228 = vector.shape_cast %227 : vector<2xf32> to vector<2x1xf32>
    %229 = vector.broadcast %228 : vector<2x1xf32> to vector<2x51xf32>
    %230 = arith.divf %226, %229 : vector<2x51xf32>
    %c0_188 = arith.constant 0 : index
    %c0_189 = arith.constant 0 : index
    %c0_190 = arith.constant 0 : index
    %c0_191 = arith.constant 0 : index
    %231 = vector.load %arg14[%c0_188, %c0_189, %c0_190, %c0_191] : memref<1x6x2x51xf32, #tpu.memory_space<vmem>>, vector<1x1x2x51xf32>
    %232 = vector.shape_cast %231 : vector<1x1x2x51xf32> to vector<2x51xf32>
    %233 = vector.shape_cast %230 : vector<2x51xf32> to vector<1x1x2x51xf32>
    tpu.vector_store %arg14[%c0_188, %c0_189, %c0_190, %c0_191], %233 {strides = array<i32>} : memref<1x6x2x51xf32, #tpu.memory_space<vmem>>, vector<1x1x2x51xf32>,
    %234 = arith.addf %170, %184 : vector<2x51xf32>
    %235 = arith.subf %234, %219 : vector<2x51xf32>
    %cst_192 = arith.constant dense<0xFF800000> : vector<2xf32>
    %236 = vector.multi_reduction <maximumf>, %235, %cst_192 [1] : vector<2x51xf32> to vector<2xf32>
    %237 = vector.shape_cast %236 : vector<2xf32> to vector<2x1xf32>
    %238 = vector.broadcast %237 : vector<2x1xf32> to vector<2x51xf32>
    %239 = arith.subf %235, %238 : vector<2x51xf32>
    %240 = math.exp %239 : vector<2x51xf32>
    %cst_193 = arith.constant dense<0.000000e+00> : vector<2xf32>
    %241 = vector.multi_reduction <add>, %240, %cst_193 [1] : vector<2x51xf32> to vector<2xf32>
    %242 = vector.shape_cast %241 : vector<2xf32> to vector<2x1xf32>
    %243 = vector.broadcast %242 : vector<2x1xf32> to vector<2x51xf32>
    %244 = arith.divf %240, %243 : vector<2x51xf32>
    %c0_194 = arith.constant 0 : index
    %c1_195 = arith.constant 1 : index
    %c0_196 = arith.constant 0 : index
    %c0_197 = arith.constant 0 : index
    %245 = vector.load %arg14[%c0_194, %c1_195, %c0_196, %c0_197] : memref<1x6x2x51xf32, #tpu.memory_space<vmem>>, vector<1x1x2x51xf32>
    %246 = vector.shape_cast %245 : vector<1x1x2x51xf32> to vector<2x51xf32>
    %247 = vector.shape_cast %244 : vector<2x51xf32> to vector<1x1x2x51xf32>
    tpu.vector_store %arg14[%c0_194, %c1_195, %c0_196, %c0_197], %247 {strides = array<i32>} : memref<1x6x2x51xf32, #tpu.memory_space<vmem>>, vector<1x1x2x51xf32>,
    %248 = arith.addf %170, %191 : vector<2x51xf32>
    %249 = arith.subf %248, %219 : vector<2x51xf32>
    %cst_198 = arith.constant dense<0xFF800000> : vector<2xf32>
    %250 = vector.multi_reduction <maximumf>, %249, %cst_198 [1] : vector<2x51xf32> to vector<2xf32>
    %251 = vector.shape_cast %250 : vector<2xf32> to vector<2x1xf32>
    %252 = vector.broadcast %251 : vector<2x1xf32> to vector<2x51xf32>
    %253 = arith.subf %249, %252 : vector<2x51xf32>
    %254 = math.exp %253 : vector<2x51xf32>
    %cst_199 = arith.constant dense<0.000000e+00> : vector<2xf32>
    %255 = vector.multi_reduction <add>, %254, %cst_199 [1] : vector<2x51xf32> to vector<2xf32>
    %256 = vector.shape_cast %255 : vector<2xf32> to vector<2x1xf32>
    %257 = vector.broadcast %256 : vector<2x1xf32> to vector<2x51xf32>
    %258 = arith.divf %254, %257 : vector<2x51xf32>
    %c0_200 = arith.constant 0 : index
    %c2_201 = arith.constant 2 : index
    %c0_202 = arith.constant 0 : index
    %c0_203 = arith.constant 0 : index
    %259 = vector.load %arg14[%c0_200, %c2_201, %c0_202, %c0_203] : memref<1x6x2x51xf32, #tpu.memory_space<vmem>>, vector<1x1x2x51xf32>
    %260 = vector.shape_cast %259 : vector<1x1x2x51xf32> to vector<2x51xf32>
    %261 = vector.shape_cast %258 : vector<2x51xf32> to vector<1x1x2x51xf32>
    tpu.vector_store %arg14[%c0_200, %c2_201, %c0_202, %c0_203], %261 {strides = array<i32>} : memref<1x6x2x51xf32, #tpu.memory_space<vmem>>, vector<1x1x2x51xf32>,
    %262 = arith.addf %170, %198 : vector<2x51xf32>
    %263 = arith.subf %262, %219 : vector<2x51xf32>
    %cst_204 = arith.constant dense<0xFF800000> : vector<2xf32>
    %264 = vector.multi_reduction <maximumf>, %263, %cst_204 [1] : vector<2x51xf32> to vector<2xf32>
    %265 = vector.shape_cast %264 : vector<2xf32> to vector<2x1xf32>
    %266 = vector.broadcast %265 : vector<2x1xf32> to vector<2x51xf32>
    %267 = arith.subf %263, %266 : vector<2x51xf32>
    %268 = math.exp %267 : vector<2x51xf32>
    %cst_205 = arith.constant dense<0.000000e+00> : vector<2xf32>
    %269 = vector.multi_reduction <add>, %268, %cst_205 [1] : vector<2x51xf32> to vector<2xf32>
    %270 = vector.shape_cast %269 : vector<2xf32> to vector<2x1xf32>
    %271 = vector.broadcast %270 : vector<2x1xf32> to vector<2x51xf32>
    %272 = arith.divf %268, %271 : vector<2x51xf32>
    %c0_206 = arith.constant 0 : index
    %c3_207 = arith.constant 3 : index
    %c0_208 = arith.constant 0 : index
    %c0_209 = arith.constant 0 : index
    %273 = vector.load %arg14[%c0_206, %c3_207, %c0_208, %c0_209] : memref<1x6x2x51xf32, #tpu.memory_space<vmem>>, vector<1x1x2x51xf32>
    %274 = vector.shape_cast %273 : vector<1x1x2x51xf32> to vector<2x51xf32>
    %275 = vector.shape_cast %272 : vector<2x51xf32> to vector<1x1x2x51xf32>
    tpu.vector_store %arg14[%c0_206, %c3_207, %c0_208, %c0_209], %275 {strides = array<i32>} : memref<1x6x2x51xf32, #tpu.memory_space<vmem>>, vector<1x1x2x51xf32>,
    %276 = arith.addf %170, %205 : vector<2x51xf32>
    %277 = arith.subf %276, %219 : vector<2x51xf32>
    %cst_210 = arith.constant dense<0xFF800000> : vector<2xf32>
    %278 = vector.multi_reduction <maximumf>, %277, %cst_210 [1] : vector<2x51xf32> to vector<2xf32>
    %279 = vector.shape_cast %278 : vector<2xf32> to vector<2x1xf32>
    %280 = vector.broadcast %279 : vector<2x1xf32> to vector<2x51xf32>
    %281 = arith.subf %277, %280 : vector<2x51xf32>
    %282 = math.exp %281 : vector<2x51xf32>
    %cst_211 = arith.constant dense<0.000000e+00> : vector<2xf32>
    %283 = vector.multi_reduction <add>, %282, %cst_211 [1] : vector<2x51xf32> to vector<2xf32>
    %284 = vector.shape_cast %283 : vector<2xf32> to vector<2x1xf32>
    %285 = vector.broadcast %284 : vector<2x1xf32> to vector<2x51xf32>
    %286 = arith.divf %282, %285 : vector<2x51xf32>
    %c0_212 = arith.constant 0 : index
    %c4_213 = arith.constant 4 : index
    %c0_214 = arith.constant 0 : index
    %c0_215 = arith.constant 0 : index
    %287 = vector.load %arg14[%c0_212, %c4_213, %c0_214, %c0_215] : memref<1x6x2x51xf32, #tpu.memory_space<vmem>>, vector<1x1x2x51xf32>
    %288 = vector.shape_cast %287 : vector<1x1x2x51xf32> to vector<2x51xf32>
    %289 = vector.shape_cast %286 : vector<2x51xf32> to vector<1x1x2x51xf32>
    tpu.vector_store %arg14[%c0_212, %c4_213, %c0_214, %c0_215], %289 {strides = array<i32>} : memref<1x6x2x51xf32, #tpu.memory_space<vmem>>, vector<1x1x2x51xf32>,
    %290 = arith.addf %170, %212 : vector<2x51xf32>
    %291 = arith.subf %290, %219 : vector<2x51xf32>
    %cst_216 = arith.constant dense<0xFF800000> : vector<2xf32>
    %292 = vector.multi_reduction <maximumf>, %291, %cst_216 [1] : vector<2x51xf32> to vector<2xf32>
    %293 = vector.shape_cast %292 : vector<2xf32> to vector<2x1xf32>
    %294 = vector.broadcast %293 : vector<2x1xf32> to vector<2x51xf32>
    %295 = arith.subf %291, %294 : vector<2x51xf32>
    %296 = math.exp %295 : vector<2x51xf32>
    %cst_217 = arith.constant dense<0.000000e+00> : vector<2xf32>
    %297 = vector.multi_reduction <add>, %296, %cst_217 [1] : vector<2x51xf32> to vector<2xf32>
    %298 = vector.shape_cast %297 : vector<2xf32> to vector<2x1xf32>
    %299 = vector.broadcast %298 : vector<2x1xf32> to vector<2x51xf32>
    %300 = arith.divf %296, %299 : vector<2x51xf32>
    %c0_218 = arith.constant 0 : index
    %c5_219 = arith.constant 5 : index
    %c0_220 = arith.constant 0 : index
    %c0_221 = arith.constant 0 : index
    %301 = vector.load %arg14[%c0_218, %c5_219, %c0_220, %c0_221] : memref<1x6x2x51xf32, #tpu.memory_space<vmem>>, vector<1x1x2x51xf32>
    %302 = vector.shape_cast %301 : vector<1x1x2x51xf32> to vector<2x51xf32>
    %303 = vector.shape_cast %300 : vector<2x51xf32> to vector<1x1x2x51xf32>
    tpu.vector_store %arg14[%c0_218, %c5_219, %c0_220, %c0_221], %303 {strides = array<i32>} : memref<1x6x2x51xf32, #tpu.memory_space<vmem>>, vector<1x1x2x51xf32>,
    return
  }
  func.func @transform_0(%arg0: i32) -> (i32, i32) {
    %c0_i32 = arith.constant 0 : i32
    %c0_i32_0 = arith.constant 0 : i32
    %c0_i32_1 = arith.constant 0 : i32
    return %c0_i32, %c0_i32_0 : i32, i32
  }
  func.func @transform_1(%arg0: i32) -> (i32, i32, i32) {
    %c0_i32 = arith.constant 0 : i32
    %c0_i32_0 = arith.constant 0 : i32
    %c0_i32_1 = arith.constant 0 : i32
    return %arg0, %c0_i32, %c0_i32_0 : i32, i32, i32
  }
  func.func @transform_2(%arg0: i32) -> (i32, i32, i32) {
    %c0_i32 = arith.constant 0 : i32
    %c0_i32_0 = arith.constant 0 : i32
    %c0_i32_1 = arith.constant 0 : i32
    return %arg0, %c0_i32, %c0_i32_0 : i32, i32, i32
  }
  func.func @transform_3(%arg0: i32) -> (i32, i32, i32, i32) {
    %c0_i32 = arith.constant 0 : i32
    %c0_i32_0 = arith.constant 0 : i32
    %c0_i32_1 = arith.constant 0 : i32
    %c0_i32_2 = arith.constant 0 : i32
    return %arg0, %c0_i32, %c0_i32_0, %c0_i32_1 : i32, i32, i32, i32
  }
  func.func @transform_4(%arg0: i32) -> (i32, i32, i32) {
    %c0_i32 = arith.constant 0 : i32
    %c0_i32_0 = arith.constant 0 : i32
    %c0_i32_1 = arith.constant 0 : i32
    return %arg0, %c0_i32, %c0_i32_0 : i32, i32, i32
  }
  func.func @transform_5(%arg0: i32) -> (i32, i32, i32) {
    %c0_i32 = arith.constant 0 : i32
    %c0_i32_0 = arith.constant 0 : i32
    %c0_i32_1 = arith.constant 0 : i32
    return %arg0, %c0_i32, %c0_i32_0 : i32, i32, i32
  }
  func.func @transform_6(%arg0: i32) -> (i32, i32, i32) {
    %c0_i32 = arith.constant 0 : i32
    %c0_i32_0 = arith.constant 0 : i32
    %c0_i32_1 = arith.constant 0 : i32
    return %arg0, %c0_i32, %c0_i32_0 : i32, i32, i32
  }
  func.func @transform_7(%arg0: i32) -> (i32, i32, i32) {
    %c0_i32 = arith.constant 0 : i32
    %c0_i32_0 = arith.constant 0 : i32
    %c0_i32_1 = arith.constant 0 : i32
    return %arg0, %c0_i32, %c0_i32_0 : i32, i32, i32
  }
  func.func @transform_8(%arg0: i32) -> (i32, i32, i32) {
    %c0_i32 = arith.constant 0 : i32
    %c0_i32_0 = arith.constant 0 : i32
    %c0_i32_1 = arith.constant 0 : i32
    return %arg0, %c0_i32, %c0_i32_0 : i32, i32, i32
  }
  func.func @transform_9(%arg0: i32) -> (i32, i32, i32) {
    %c0_i32 = arith.constant 0 : i32
    %c0_i32_0 = arith.constant 0 : i32
    %c0_i32_1 = arith.constant 0 : i32
    return %arg0, %c0_i32, %c0_i32_0 : i32, i32, i32
  }
  func.func @transform_10(%arg0: i32) -> (i32, i32, i32) {
    %c0_i32 = arith.constant 0 : i32
    %c0_i32_0 = arith.constant 0 : i32
    %c0_i32_1 = arith.constant 0 : i32
    return %arg0, %c0_i32, %c0_i32_0 : i32, i32, i32
  }
  func.func @transform_11(%arg0: i32) -> (i32, i32, i32, i32) {
    %c0_i32 = arith.constant 0 : i32
    %c0_i32_0 = arith.constant 0 : i32
    %c0_i32_1 = arith.constant 0 : i32
    %c0_i32_2 = arith.constant 0 : i32
    return %arg0, %c0_i32, %c0_i32_0, %c0_i32_1 : i32, i32, i32, i32
  }
  func.func @transform_12(%arg0: i32) -> (i32, i32, i32) {
    %c0_i32 = arith.constant 0 : i32
    %c0_i32_0 = arith.constant 0 : i32
    %c0_i32_1 = arith.constant 0 : i32
    return %arg0, %c0_i32, %c0_i32_0 : i32, i32, i32
  }
  func.func @transform_13(%arg0: i32) -> (i32, i32, i32, i32) {
    %c0_i32 = arith.constant 0 : i32
    %c0_i32_0 = arith.constant 0 : i32
    %c0_i32_1 = arith.constant 0 : i32
    %c0_i32_2 = arith.constant 0 : i32
    return %arg0, %c0_i32, %c0_i32_0, %c0_i32_1 : i32, i32, i32, i32
  }
}

</mosaic_0001>

<bundles_post_ra>
// kernel: multi_dqn_forward.1
= control target key start
LH: loop header
LB: loop body
LE: loop exit
PB: predicated region body
PF: predicated region fallthrough
CT: control target
= control target key end

     0   :  { %s4714_s0 = inlined_call_operand.vmem [shape: bf16[50,100], index: 0, kind: input, shape index: {}]   ;;  %s4715_s1 = inlined_call_operand.vmem [shape: bf16[2,100,32], index: 1, kind: input, shape index: {}]   ;;  %s4716_s2 = inlined_call_operand.vmem [shape: f32[2,1,32], index: 2, kind: input, shape index: {}]   ;;  %s4717_s3 = inlined_call_operand.vmem [shape: bf16[2,25,32,64], index: 3, kind: input, shape index: {}]   ;;  %s4718_s4 = inlined_call_operand.vmem [shape: f32[2,1,64], index: 4, kind: input, shape index: {}]   ;;  %s4719_s5 = inlined_call_operand.vmem [shape: bf16[2,64,32], index: 5, kind: input, shape index: {}]   ;;  %s4720_s6 = inlined_call_operand.vmem [shape: f32[2,1,32], index: 6, kind: input, shape index: {}]   ;;  %s4721_s7 = inlined_call_operand.vmem [shape: bf16[2,64,32], index: 7, kind: input, shape index: {}]   ;;  %s4722_s8 = inlined_call_operand.vmem [shape: f32[2,1,32], index: 8, kind: input, shape index: {}]   ;;  %s4723_s9 = inlined_call_operand.vmem [shape: bf16[2,32,51], index: 9, kind: input, shape index: {}]   ;;  %s4724_s10 = inlined_call_operand.vmem [shape: f32[2,1,51], index: 10, kind: input, shape index: {}]   ;;  %s4725_s11 = inlined_call_operand.vmem [shape: bf16[2,6,32,51], index: 11, kind: input, shape index: {}]   ;;  %s4726_s12 = inlined_call_operand.vmem [shape: f32[2,6,51], index: 12, kind: input, shape index: {}]   ;;  %s4727_s13 = inlined_call_operand.hbm [shape: f32[2,6,2,51], index: 13, kind: output, shape index: {}]  }
   0x1   :  { %4728 = sst [smem:[#allocation6_spill]] %s4714_s0 }
   0x2   :  { %18 = vsyncpa [#allocation3], 0 }
   0x3   :  { %20 = vsyncpa [#allocation3 + $0x1], 0  ;;  %s4242_s25 = smov 0   ;;  %s4244_s26 = smov 0  }
   0x4   :  { %s4246_s27 = smov 0   ;;  %s4248_s28 = smov 0  }
   0x5 LB: > { %s4263_s29 = sadd.s32 4294967295, %s4165_s28   ;;  %s3255_s30 = sadd.s32 4294967294, %s4165_s28   ;;  %s4165_s28 = sphi %s4248_s28, %s4737_s28   ;;  %s4161_s27 = sphi %s4246_s27, %s4736_s27   ;;  %s4157_s26 = sphi %s4244_s26, %s4735_s26   ;;  %s4153_s25 = sphi %s4242_s25, %s4734_s25  }
   0x6   : > { %s4267_s14 = sadd.s32 1, %s4165_s28   ;;  %s366_s15 = sadd.s32 1, %s4161_s27 }
   0x7   : > { %s363_s16 = ssub.s32 %s4165_s28, %s4267_s14  ;;  %p376_p0 = scmp.ne.s32.totalorder %s4161_s27, %s4157_s26 }
   0x8   : > { %p364_p1 = scmp.eq.s32.totalorder %s363_s16, 0  ;;  %p377_p2 = scmp.eq.s32.totalorder %s4263_s29, 1 }
   0x9   : > { %p382_p3 = scmp.ne.s32.totalorder %s4157_s26, %s4153_s25  ;;  %p383_p4 = scmp.eq.s32.totalorder %s3255_s30, 1 }
   0xa   : > { %s4278_s17 = scalar_select %p364_p1, %s4161_s27, %s366_s15  }
   0xb   : > { %p4280_p5 = por %p377_p2, %p376_p0  ;;  %p4284_p6 = por %p383_p4, %p382_p3 }
   0xc   : > { %4729 = sst [smem:[#allocation5_spill]] %s4278_s17  ;;  %p3258_p7 = scmp.ge.s32.totalorder %s4165_s28, 1 }
   0xd   : > { %p489_p8 = scmp.lt.s32.totalorder %s4165_s28, 3 }
   0xf   : > { %p490_p9 = pnand %p3258_p7, %p489_p8 }
  0x10   : > { %p577_p10 = scmp.lt.s32.totalorder (!%p490_p9), %s4263_s29, 1  ;;  %s4732_s0 = sld [smem:[#allocation6_spill]] (!%p490_p9)  ;;  %vm711_vm0 = vcmask (!%p490_p9), 818176   ;;  %vm724_vm1 = vcmask (!%p490_p9), 1041408   ;;  %v4167_v14 = vmov (!%p490_p9), 0.0   ;;  %vm4168_vm2 = vmmov (!%p490_p9), 0  }
  0x11   : > { %493 = sbr.rel (%p490_p9) target bundleno = 1416 (0x588), region = 72  ;;  %3667 = vmatprep.subr.bf16.mxu1 (!%p490_p9), %v4167_v14  ;;  %3671 = vmatprep.mubr.msk.bf16.mxu1 (!%p490_p9), %vm4168_vm2, %v4167_v14  ;;  %vm826_vm3 = vcmask (!%p490_p9), 261120   ;;  %vm2399_vm4 = vcmask (!%p490_p9), 523264   ;;  %vm2974_vm5 = vcmask (!%p490_p9), 410624  }
  0x16   : > { %v4003_v0 = vld [vmem:[%s4732_s0] sm:$0xff] (!%p490_p9)   ;;  %v4004_v9 = vld [vmem:[%s4732_s0 + $0x8] sm:$0xff] (!%p490_p9)   ;;  %v4005_v10 = vld [vmem:[%s4732_s0 + $0x10] sm:$0xff] (!%p490_p9)  }
  0x17   : > { %3659 = vmatprep.mubr.msk.bf16.mxu0 (!%p490_p9), %vm711_vm0, %v4003_v0  ;;  %v4006_v11 = vld [vmem:[%s4732_s0 + $0x18] ss:$0 sps:$4 sm:$0x11] (!%p490_p9)  }
  0x18   : > { %s4295_s22 = scalar_select %p577_p10, %s4263_s29, 1 }
  0x1a   : > { %s3949_s23 = smul.u32 52, %s4295_s22  ;;  %s584_s24 = scalar_lea.vmem %s4716_s2, %s4295_s22 }
  0x1b   : > { %s3950_s16 = smul.u32 400, %s4295_s22  ;;  %v3269_v17 = vld [vmem:[%s584_s24] ss:$0 sm:$0xff]  ;;  %s3525_s30 = sshll.u32 %s4295_s22, 5 }
  0x1c   : > { %s581_s15 = scalar_lea.vmem %s4715_s1, %s3949_s23  ;;  %s605_s23 = scalar_lea.vmem %s4721_s7, %s3525_s30 }
  0x1d   : > { %v3996_v1 = vld [vmem:[%s581_s15] sm:$0xff]   ;;  %v3997_v2 = vld [vmem:[%s581_s15 + $0x8] sm:$0xff]   ;;  %v3998_v3 = vld [vmem:[%s581_s15 + $0x10] sm:$0xff]   ;;  %s4306_s17 = scalar_lea.vmem %s4717_s3, %s3950_s16  ;;  %s3527_s24 = sshll.u32 %s4295_s22, 4 }
  0x1e   : > { %3645 = vmatprep.subr.bf16.mxu0 %v3996_v1  ;;  %v4002_v4 = vld [vmem:[%s581_s15 + $0x30] ss:$0 sps:$4 sm:$0x33]   ;;  %v3999_v5 = vld [vmem:[%s581_s15 + $0x18] sm:$0xff]   ;;  %v4000_v7 = vld [vmem:[%s581_s15 + $0x20] sm:$0xff]   ;;  %s592_s21 = scalar_lea.vmem %s4718_s4, %s4295_s22 }
  0x1f   : > { %3646 = vmatpush3.bf16.msra.mxu0 %v3996_v1  ;;  %v726_v6 = vsel %vm724_vm1, %v4002_v4, 0  ;;  %v4001_v8 = vld [vmem:[%s581_s15 + $0x28] sm:$0xff]   ;;  %v4007_v12 = vld [vmem:[%s4306_s17 + $0x10] sm:$0xff]   ;;  %v4009_v15 = vld [vmem:[%s4306_s17 + $0x18] sm:$0xff]   ;;  %s4557_s15 = scalar_lea.vmem %s4723_s9, %s3527_s24 }
  0x20   : > { %3647 = vmatprep.subr.bf16.mxu0 %v3997_v2  ;;  %v4008_v13 = vld [vmem:[%s4306_s17 + $0x50] sm:$0xff]   ;;  %3668 = vmatpush3.bf16.msra.mxu1 %v4007_v12  ;;  %v4010_v16 = vld [vmem:[%s4306_s17 + $0x58] sm:$0xff]   ;;  %v4011_v33 = vld [vmem:[%s4306_s17] sm:$0xff]  }
  0x21   : > { %3669 = vmatprep.subr.bf16.mxu1 %v4167_v14  ;;  %v4012_v34 = vld [vmem:[%s4306_s17 + $0x70] sm:$0xff]   ;;  %v4013_v43 = vld [vmem:[%s4306_s17 + $0x8] sm:$0xff]   ;;  %v4014_v44 = vld [vmem:[%s4306_s17 + $0x78] sm:$0xff]  }
  0x22   : > { %v4015_v48 = vld [vmem:[%s4306_s17 + $0x20] sm:$0xff]   ;;  %v4016_v49 = vld [vmem:[%s4306_s17 + $0x90] sm:$0xff]   ;;  %v4017_v51 = vld [vmem:[%s4306_s17 + $0x28] sm:$0xff]  }
  0x23   : > { %3648 = vmatpush3.bf16.msra.mxu0 %v3997_v2  ;;  %v4018_v52 = vld [vmem:[%s4306_s17 + $0x98] sm:$0xff]   ;;  %v4019_v53 = vld [vmem:[%s4306_s17 + $0x30] sm:$0xff]   ;;  %v4023_v59 = vld [vmem:[%s4306_s17 + $0x40] sm:$0xff]  }
  0x24   : > { %3649 = vmatprep.subr.bf16.mxu0 %v3998_v3  ;;  %3670 = vmatpush3.bf16.msra.mxu1 %v4009_v15  ;;  %v4020_v54 = vld [vmem:[%s4306_s17 + $0xb0] sm:$0xff]   ;;  %v4021_v57 = vld [vmem:[%s4306_s17 + $0x38] sm:$0xff]   ;;  %v4025_v63 = vld [vmem:[%s4306_s17 + $0x48] sm:$0xff]  }
  0x25   : > { %3675 = vmatprep.subr.bf16.mxu1 %v4167_v14  ;;  %v4022_v58 = vld [vmem:[%s4306_s17 + $0xb8] sm:$0xff]   ;;  %v4024_v60 = vld [vmem:[%s4306_s17 + $0xd0] sm:$0xff]   ;;  %v4027_v1 = vld [vmem:[%s4306_s17 + $0x60] sm:$0xff]  }
  0x26   : > { %v4026_v0 = vld [vmem:[%s4306_s17 + $0xd8] sm:$0xff]   ;;  %v4028_v2 = vld [vmem:[%s4306_s17 + $0xf0] sm:$0xff]   ;;  %v4034_v15 = vld [vmem:[%s4306_s17 + $0xa0] sm:$0xff]  }
  0x27   : > { %3650 = vmatpush3.bf16.msra.mxu0 %v3998_v3  ;;  %v4035_v12 = vld [vmem:[%s4306_s17 + $0x118] sm:$0xff]  }
  0x28   : > { %3651 = vmatprep.subr.bf16.mxu0 %v3999_v5 }
  0x2b   : > { %3652 = vmatpush3.bf16.msra.mxu0 %v3999_v5  ;;  %v4029_v5 = vld [vmem:[%s4306_s17 + $0x68] sm:$0xff]  }
  0x2c   : > { %3653 = vmatprep.subr.bf16.mxu0 %v4000_v7 }
  0x2f   : > { %3654 = vmatpush3.bf16.msra.mxu0 %v4000_v7  ;;  %v4031_v7 = vld [vmem:[%s4306_s17 + $0x80] sm:$0xff]  }
  0x30   : > { %3655 = vmatprep.subr.bf16.mxu0 %v4001_v8 }
  0x33   : > { %3656 = vmatpush3.bf16.msra.mxu0 %v4001_v8  ;;  %v4033_v8 = vld [vmem:[%s4306_s17 + $0x110] sm:$0xff]  }
  0x34   : > { %3947 = vmatprep.subr.msk.bf16.mxu0 %vm724_vm1, %v4002_v4 }
  0x37   : > { %3658 = vmatpush3.bf16.msra.mxu0 %v726_v6  ;;  %v4030_v6 = vld [vmem:[%s4306_s17 + $0xf8] sm:$0xff]  }
  0x38   : > { %3707 = vmatprep.subr.bf16.mxu0 %v4167_v14 }
  0x3a   : > { %3660 = vmatmul.mubr.msk.bf16.vlgmr.msra.gmra.mrb[0].mxu0 %vm711_vm0, %v4004_v9 }
  0x3b   : > { %3663 = vmatprep.mubr.msk.bf16.mxu0 %vm711_vm0, %v4005_v10  ;;  %3708 = vmatpush3.bf16.msra.mxu0 %v4008_v13 }
  0x3c   : > { %3709 = vmatprep.subr.bf16.mxu0 %v4167_v14 }
  0x3f   : > { %3710 = vmatpush3.bf16.msra.mxu0 %v4010_v16  ;;  %v4037_v16 = vld [vmem:[%s4306_s17 + $0x130] sm:$0xff]  }
  0x40   : > { %3723 = vmatprep.subr.bf16.mxu0 %v4167_v14 }
  0x42   : > { %3664 = vmatmul.mubr.msk.bf16.gmra.mrb[4].mxu0 %vm711_vm0, %v4006_v11  ;;  %v4032_v11 = vld [vmem:[%s4306_s17 + $0x88] sm:$0xff]  }
  0x43   : > { %3711 = vmatprep.mubr.msk.bf16.mxu0 %vm4168_vm2, %v4167_v14 }
 0x10d   : > { %v3661_v18 = vpop.f32.mrb[0].mxu0 }
 0x10e   : > { %v771_v19 = vadd.f32 %v3661_v18, %v3269_v17  ;;  %v762_v20 = vpop.f32.mrb[1].mxu0  ;;  %v4039_v18 = vld [vmem:[%s4306_s17 + $0x138] sm:$0xff]  }
 0x10f   : > { %v763_v21 = vadd.f32 %v3269_v17, %v762_v20  ;;  %v3662_v22 = vpop.f32.mrb[2].mxu0  ;;  %v4038_v20 = vld [vmem:[%s4306_s17 + $0xc0] sm:$0xff]  }
 0x110   : > { %v774_v23 = vadd.f32 %v3662_v22, %v3269_v17  ;;  %v765_v24 = vpop.f32.mrb[3].mxu0  ;;  %v794_v26 = vmax.f32 %v771_v19, 0.0 }
 0x111   : > { %v766_v25 = vadd.f32 %v3269_v17, %v765_v24  ;;  %v792_v28 = vmax.f32 %v763_v21, 0.0  ;;  %v4041_v21 = vld [vmem:[%s4306_s17 + $0x150] sm:$0xff]   ;;  %v4043_v24 = vld [vmem:[%s4306_s17 + $0x158] sm:$0xff]  }
 0x112   : > { %v795_v27 = vmax.f32 %v774_v23, 0.0  ;;  %v4040_v23 = vld [vmem:[%s4306_s17 + $0xc8] sm:$0xff]  }
 0x113   : > { %v793_v29 = vmax.f32 %v766_v25, 0.0 }
 0x114   : > { %v4340_v30 = vpack.c.bf16 %v795_v27, %v794_v26  ;;  %v4042_v26 = vld [vmem:[%s4306_s17 + $0xe0] sm:$0xff]   ;;  %v4045_v27 = vld [vmem:[%s4306_s17 + $0x170] sm:$0xff]  }
 0x115   : > { %v4342_v31 = vpack.c.bf16 %v793_v29, %v792_v28  ;;  %v3665_v32 = vpop.f32.mrb[4].mxu0  ;;  %v4044_v29 = vld [vmem:[%s4306_s17 + $0xe8] sm:$0xff]  }
 0x116   : > { %v4346_v35 = vadd.f32 %v3665_v32, %v3269_v17  ;;  %v778_v36 = vpop.f32.mrb[5].mxu0  ;;  %v1364_v56 = vrot.slane %v4340_v30, 1  ;;  %v1488_v62 = vrot.slane %v4340_v30, 3  ;;  %v1612_v4 = vrot.slane %v4340_v30, 5 }
 0x117   : > { %v813_v37 = vrot.slane %v4342_v31, 1  ;;  %v1116_v38 = vrot.slane %v4342_v31, 5  ;;  %v3666_v39 = vpop.f32.mrb[6].mxu0  ;;  %v779_v41 = vadd.f32 %v3269_v17, %v778_v36  ;;  %v1240_v50 = vrot.slane %v4342_v31, 7  ;;  %v4048_v36 = vld [vmem:[%s4306_s17 + $0x108] sm:$0xff]  }
 0x118   : > { %v781_v40 = vpop.f32.mrb[7].mxu0  ;;  %v930_v55 = vrot.slane %v4342_v31, 2  ;;  %v992_v61 = vrot.slane %v4342_v31, 3  ;;  %v1054_v3 = vrot.slane %v4342_v31, 4  ;;  %v1178_v9 = vrot.slane %v4342_v31, 6 }
 0x119   : > { %3672 = vmatmul.mubr.msk.bf16.vlgmr.msra.gmra.mrb[0].mxu1 %vm826_vm3, %v813_v37  ;;  %3712 = vmatmul.mubr.msk.bf16.vlgmr.msra.gmra.mrb[8].mxu0 %vm826_vm3, %v1116_v38  ;;  %v782_v42 = vadd.f32 %v3269_v17, %v781_v40  ;;  %v796_v45 = vmax.f32 %v779_v41, 0.0  ;;  %v1736_v10 = vrot.slane %v4340_v30, 7  ;;  %v4036_v17 = vld [vmem:[%s4306_s17 + $0xa8] sm:$0xff]   ;;  %v1426_v22 = vrot.slane %v4340_v30, 2  ;;  %v4051_v38 = vld [vmem:[%s4306_s17 + $0x140] sm:$0xff]  }
 0x11a   : > { %3676 = vmatpush3.bf16.msra.mxu1 %v4011_v33  ;;  %3724 = vmatpush3.bf16.msra.mxu0 %v4012_v34  ;;  %v1550_v28 = vrot.slane %v4340_v30, 4  ;;  %v4046_v33 = vld [vmem:[%s4306_s17 + $0x100] sm:$0xff]   ;;  %v1674_v34 = vrot.slane %v4340_v30, 6  ;;  %v4050_v37 = vld [vmem:[%s4306_s17 + $0x128] sm:$0xff]  }
 0x11b   : > { %3677 = vmatprep.subr.bf16.mxu1 %v4167_v14  ;;  %3725 = vmatprep.subr.bf16.mxu0 %v4167_v14  ;;  %v797_v46 = vmax.f32 %v782_v42, 0.0  ;;  %v4052_v40 = vld [vmem:[%s4306_s17 + $0x148] sm:$0xff]   ;;  %v4053_v41 = vld [vmem:[%s4306_s17 + $0x160] sm:$0xff]  }
 0x11c   : > { %3679 = vmatprep.mubr.msk.bf16.mxu1 %vm4168_vm2, %v4167_v14  ;;  %3727 = vmatprep.mubr.msk.bf16.mxu0 %vm4168_vm2, %v4167_v14 }
 0x11d   : > { %v4360_v47 = vpack.c.bf16 %v797_v46, %v796_v45  ;;  %v4056_v46 = vld [vmem:[%s4306_s17 + $0x188] sm:$0xff]  }
 0x11e   : > { %3678 = vmatpush3.bf16.msra.mxu1 %v4013_v43  ;;  %3726 = vmatpush3.bf16.msra.mxu0 %v4014_v44  ;;  %v4054_v43 = vld [vmem:[%s4306_s17 + $0x168] sm:$0xff]   ;;  %v4055_v44 = vld [vmem:[%s4306_s17 + $0x180] sm:$0xff]  }
 0x11f   : > { %3683 = vmatprep.subr.bf16.mxu1 %v4167_v14  ;;  %3739 = vmatprep.subr.bf16.mxu0 %v4167_v14  ;;  %v1860_v13 = vrot.slane %v4360_v47, 1  ;;  %v1984_v19 = vrot.slane %v4360_v47, 3  ;;  %v2108_v25 = vrot.slane %v4360_v47, 5  ;;  %v2232_v32 = vrot.slane %v4360_v47, 7 }
 0x120   : > { %v1922_v39 = vrot.slane %v4360_v47, 2  ;;  %v2046_v42 = vrot.slane %v4360_v47, 4  ;;  %v2170_v45 = vrot.slane %v4360_v47, 6 }
 0x121   : > { %3680 = vmatmul.mubr.msk.bf16.vlgmr.msra.gmra.mrb[4].mxu1 %vm826_vm3, %v4342_v31  ;;  %3728 = vmatmul.mubr.msk.bf16.vlgmr.msra.gmra.mrb[12].mxu0 %vm826_vm3, %v1240_v50  ;;  %v4047_v31 = vld [vmem:[%s4306_s17 + $0x178] sm:$0xff]  }
 0x122   : > { %3684 = vmatpush3.bf16.msra.mxu1 %v4015_v48  ;;  %3740 = vmatpush3.bf16.msra.mxu0 %v4016_v49  ;;  %v798_v48 = vmax.f32 %v4346_v35, 0.0 }
 0x123   : > { %3685 = vmatprep.subr.bf16.mxu1 %v4167_v14  ;;  %3741 = vmatprep.subr.bf16.mxu0 %v4167_v14 }
 0x124   : > { %3687 = vmatprep.mubr.msk.bf16.mxu1 %vm4168_vm2, %v4167_v14  ;;  %3743 = vmatprep.mubr.msk.bf16.mxu0 %vm4168_vm2, %v4167_v14  ;;  %v802_v49 = vpack.c.bf16 %v798_v48, %v798_v48 }
 0x126   : > { %3686 = vmatpush3.bf16.msra.mxu1 %v4017_v51  ;;  %3742 = vmatpush3.bf16.msra.mxu0 %v4018_v52  ;;  %v4060_v51 = vld [vmem:[%s605_s23 + $0x8] sm:$0xff]  }
 0x127   : > { %3691 = vmatprep.subr.bf16.mxu1 %v4167_v14  ;;  %3755 = vmatprep.subr.bf16.mxu0 %v4167_v14 }
 0x129   : > { %3688 = vmatmul.mubr.msk.bf16.vlgmr.msra.gmra.mrb[8].mxu1 %vm826_vm3, %v930_v55  ;;  %3744 = vmatmul.mubr.msk.bf16.vlgmr.msra.gmra.mrb[16].mxu0 %vm826_vm3, %v1364_v56  ;;  %v4064_v55 = vld [vmem:[%s605_s23 + $0x18] sm:$0xff]  }
 0x12a   : > { %3692 = vmatpush3.bf16.msra.mxu1 %v4019_v53  ;;  %3756 = vmatpush3.bf16.msra.mxu0 %v4020_v54  ;;  %v4062_v53 = vld [vmem:[%s605_s23 + $0x10] sm:$0xff]  }
 0x12b   : > { %3693 = vmatprep.subr.bf16.mxu1 %v4167_v14  ;;  %3757 = vmatprep.subr.bf16.mxu0 %v4167_v14 }
 0x12c   : > { %3695 = vmatprep.mubr.msk.bf16.mxu1 %vm4168_vm2, %v4167_v14  ;;  %3759 = vmatprep.mubr.msk.bf16.mxu0 %vm4168_vm2, %v4167_v14 }
 0x12e   : > { %3694 = vmatpush3.bf16.msra.mxu1 %v4021_v57  ;;  %3758 = vmatpush3.bf16.msra.mxu0 %v4022_v58 }
 0x12f   : > { %3699 = vmatprep.subr.bf16.mxu1 %v4167_v14  ;;  %3771 = vmatprep.subr.bf16.mxu0 %v4167_v14 }
 0x131   : > { %3696 = vmatmul.mubr.msk.bf16.vlgmr.msra.gmra.mrb[12].mxu1 %vm826_vm3, %v992_v61  ;;  %3760 = vmatmul.mubr.msk.bf16.vlgmr.msra.gmra.mrb[20].mxu0 %vm826_vm3, %v1488_v62 }
 0x132   : > { %3700 = vmatpush3.bf16.msra.mxu1 %v4023_v59  ;;  %3772 = vmatpush3.bf16.msra.mxu0 %v4024_v60 }
 0x133   : > { %3701 = vmatprep.subr.bf16.mxu1 %v4167_v14  ;;  %3773 = vmatprep.subr.bf16.mxu0 %v4167_v14 }
 0x134   : > { %3703 = vmatprep.mubr.msk.bf16.mxu1 %vm4168_vm2, %v4167_v14  ;;  %3775 = vmatprep.mubr.msk.bf16.mxu0 %vm4168_vm2, %v4167_v14 }
 0x136   : > { %3702 = vmatpush3.bf16.msra.mxu1 %v4025_v63  ;;  %3774 = vmatpush3.bf16.msra.mxu0 %v4026_v0 }
 0x137   : > { %3715 = vmatprep.subr.bf16.mxu1 %v4167_v14  ;;  %3787 = vmatprep.subr.bf16.mxu0 %v4167_v14 }
 0x139   : > { %3704 = vmatmul.mubr.msk.bf16.vlgmr.msra.gmra.mrb[16].mxu1 %vm826_vm3, %v1054_v3  ;;  %3776 = vmatmul.mubr.msk.bf16.vlgmr.msra.gmra.mrb[24].mxu0 %vm826_vm3, %v1612_v4 }
 0x13a   : > { %3716 = vmatpush3.bf16.msra.mxu1 %v4027_v1  ;;  %3788 = vmatpush3.bf16.msra.mxu0 %v4028_v2 }
 0x13b   : > { %3717 = vmatprep.subr.bf16.mxu1 %v4167_v14  ;;  %3789 = vmatprep.subr.bf16.mxu0 %v4167_v14 }
 0x13c   : > { %3719 = vmatprep.mubr.msk.bf16.mxu1 %vm4168_vm2, %v4167_v14  ;;  %3791 = vmatprep.mubr.msk.bf16.mxu0 %vm4168_vm2, %v4167_v14 }
 0x13e   : > { %3718 = vmatpush3.bf16.msra.mxu1 %v4029_v5  ;;  %3790 = vmatpush3.bf16.msra.mxu0 %v4030_v6 }
 0x13f   : > { %3731 = vmatprep.subr.bf16.mxu1 %v4167_v14  ;;  %3803 = vmatprep.subr.bf16.mxu0 %v4167_v14 }
 0x141   : > { %3720 = vmatmul.mubr.msk.bf16.vlgmr.msra.gmra.mrb[20].mxu1 %vm826_vm3, %v1178_v9  ;;  %3792 = vmatmul.mubr.msk.bf16.vlgmr.msra.gmra.mrb[28].mxu0 %vm826_vm3, %v1736_v10 }
 0x142   : > { %3732 = vmatpush3.bf16.msra.mxu1 %v4031_v7  ;;  %3804 = vmatpush3.bf16.msra.mxu0 %v4033_v8 }
 0x143   : > { %3733 = vmatprep.subr.bf16.mxu1 %v4167_v14  ;;  %3735 = vmatprep.mubr.msk.bf16.mxu1 %vm4168_vm2, %v4167_v14 }
 0x144   : > { %3805 = vmatprep.subr.bf16.mxu0 %v4167_v14  ;;  %3807 = vmatprep.mubr.msk.bf16.mxu0 %vm4168_vm2, %v4167_v14 }
 0x146   : > { %3734 = vmatpush3.bf16.msra.mxu1 %v4032_v11  ;;  %3806 = vmatpush3.bf16.msra.mxu0 %v4035_v12 }
 0x147   : > { %3747 = vmatprep.subr.bf16.mxu1 %v4167_v14  ;;  %3819 = vmatprep.subr.bf16.mxu0 %v4167_v14 }
 0x149   : > { %3736 = vmatmul.mubr.msk.bf16.vlgmr.msra.gmra.mrb[24].mxu1 %vm826_vm3, %v4340_v30  ;;  %3808 = vmatmul.mubr.msk.bf16.vlgmr.msra.gmra.mrb[32].mxu0 %vm826_vm3, %v1860_v13  ;;  %v4049_v30 = vld [vmem:[%s4306_s17 + $0x120] sm:$0xff]   ;;  %s597_s17 = scalar_lea.vmem %s4719_s5, %s3525_s30  ;;  %s608_s30 = scalar_lea.vmem %s4722_s8, %s4295_s22 }
 0x14a   : > { %3748 = vmatpush3.bf16.msra.mxu1 %v4034_v15  ;;  %3820 = vmatpush3.bf16.msra.mxu0 %v4037_v16  ;;  %v4057_v35 = vld [vmem:[%s597_s17] sm:$0xff]   ;;  %v4059_v50 = vld [vmem:[%s597_s17 + $0x8] sm:$0xff]   ;;  %v4061_v52 = vld [vmem:[%s597_s17 + $0x10] sm:$0xff]  }
 0x14b   : > { %3749 = vmatprep.subr.bf16.mxu1 %v4167_v14  ;;  %3751 = vmatprep.mubr.msk.bf16.mxu1 %vm4168_vm2, %v4167_v14  ;;  %v4063_v54 = vld [vmem:[%s597_s17 + $0x18] sm:$0xff]   ;;  %s3952_s17 = smul.u32 192, %s4263_s29 }
 0x14c   : > { %3821 = vmatprep.subr.bf16.mxu0 %v4167_v14  ;;  %3823 = vmatprep.mubr.msk.bf16.mxu0 %vm4168_vm2, %v4167_v14 }
 0x14d   : > { %s4666_s24 = scalar_lea.hbm %s4727_s13, %s3952_s17 }
 0x14e   : > { %3750 = vmatpush3.bf16.msra.mxu1 %v4036_v17  ;;  %3822 = vmatpush3.bf16.msra.mxu0 %v4039_v18 }
 0x14f   : > { %3763 = vmatprep.subr.bf16.mxu1 %v4167_v14  ;;  %3835 = vmatprep.subr.bf16.mxu0 %v4167_v14 }
 0x151   : > { %3752 = vmatmul.mubr.msk.bf16.vlgmr.msra.gmra.mrb[28].mxu1 %vm826_vm3, %v1426_v22  ;;  %3824 = vmatmul.mubr.msk.bf16.vlgmr.msra.gmra.mrb[36].mxu0 %vm826_vm3, %v1984_v19 }
 0x152   : > { %3764 = vmatpush3.bf16.msra.mxu1 %v4038_v20  ;;  %3836 = vmatpush3.bf16.msra.mxu0 %v4041_v21 }
 0x153   : > { %3765 = vmatprep.subr.bf16.mxu1 %v4167_v14  ;;  %3767 = vmatprep.mubr.msk.bf16.mxu1 %vm4168_vm2, %v4167_v14 }
 0x154   : > { %3837 = vmatprep.subr.bf16.mxu0 %v4167_v14  ;;  %3839 = vmatprep.mubr.msk.bf16.mxu0 %vm4168_vm2, %v4167_v14 }
 0x156   : > { %3766 = vmatpush3.bf16.msra.mxu1 %v4040_v23  ;;  %3838 = vmatpush3.bf16.msra.mxu0 %v4043_v24 }
 0x157   : > { %3779 = vmatprep.subr.bf16.mxu1 %v4167_v14  ;;  %3851 = vmatprep.subr.bf16.mxu0 %v4167_v14 }
 0x159   : > { %3768 = vmatmul.mubr.msk.bf16.vlgmr.msra.gmra.mrb[32].mxu1 %vm826_vm3, %v1550_v28  ;;  %3840 = vmatmul.mubr.msk.bf16.vlgmr.msra.gmra.mrb[40].mxu0 %vm826_vm3, %v2108_v25 }
 0x15a   : > { %3780 = vmatpush3.bf16.msra.mxu1 %v4042_v26  ;;  %3852 = vmatpush3.bf16.msra.mxu0 %v4045_v27 }
 0x15b   : > { %3781 = vmatprep.subr.bf16.mxu1 %v4167_v14  ;;  %3783 = vmatprep.mubr.msk.bf16.mxu1 %vm4168_vm2, %v4167_v14 }
 0x15c   : > { %3853 = vmatprep.subr.bf16.mxu0 %v4167_v14  ;;  %3855 = vmatprep.mubr.msk.bf16.mxu0 %vm4168_vm2, %v4167_v14 }
 0x15e   : > { %3782 = vmatpush3.bf16.msra.mxu1 %v4044_v29  ;;  %3854 = vmatpush3.bf16.msra.mxu0 %v4047_v31 }
 0x15f   : > { %3795 = vmatprep.subr.bf16.mxu1 %v4167_v14  ;;  %3867 = vmatprep.subr.bf16.mxu0 %v4167_v14 }
 0x161   : > { %3784 = vmatmul.mubr.msk.bf16.vlgmr.msra.gmra.mrb[36].mxu1 %vm826_vm3, %v1674_v34  ;;  %3856 = vmatmul.mubr.msk.bf16.vlgmr.msra.gmra.mrb[44].mxu0 %vm826_vm3, %v2232_v32 }
 0x162   : > { %3796 = vmatpush3.bf16.msra.mxu1 %v4046_v33  ;;  %3799 = vmatprep.mubr.msk.bf16.mxu1 %vm4168_vm2, %v4167_v14 }
 0x163   : > { %3797 = vmatprep.subr.bf16.mxu1 %v4167_v14  ;;  %3875 = vmatprep.mubr.msk.bf16.mxu0 %vm4168_vm2, %v4167_v14 }
 0x164   : > { %3868 = vmatpush3.bf16.msra.mxu0 %v4057_v35 }
 0x165   : > { %3869 = vmatprep.subr.bf16.mxu0 %v4167_v14 }
 0x166   : > { %3798 = vmatpush3.bf16.msra.mxu1 %v4048_v36 }
 0x167   : > { %3811 = vmatprep.subr.bf16.mxu1 %v4167_v14 }
 0x168   : > { %3870 = vmatpush3.bf16.msra.mxu0 %v4059_v50 }
 0x169   : > { %3800 = vmatmul.mubr.msk.bf16.vlgmr.msra.gmra.mrb[40].mxu1 %vm826_vm3, %v4360_v47  ;;  %v4058_v47 = vld [vmem:[%s605_s23] sm:$0xff]   ;;  %3871 = vmatprep.subr.bf16.mxu0 %v4167_v14  ;;  %s3951_s23 = smul.u32 96, %s4295_s22 }
 0x16a   : > { %3812 = vmatpush3.bf16.msra.mxu1 %v4049_v30  ;;  %3815 = vmatprep.mubr.msk.bf16.mxu1 %vm4168_vm2, %v4167_v14 }
 0x16b   : > { %3813 = vmatprep.subr.bf16.mxu1 %v4167_v14  ;;  %s4575_s16 = scalar_lea.vmem %s4725_s11, %s3951_s23 }
 0x16c   : > { %3872 = vmatpush3.bf16.msra.mxu0 %v4061_v52 }
 0x16d   : > { %3873 = vmatprep.subr.bf16.mxu0 %v4167_v14 }
 0x16e   : > { %3814 = vmatpush3.bf16.msra.mxu1 %v4050_v37 }
 0x16f   : > { %3827 = vmatprep.subr.bf16.mxu1 %v4167_v14 }
 0x170   : > { %3874 = vmatpush3.bf16.msra.mxu0 %v4063_v54 }
 0x171   : > { %3816 = vmatmul.mubr.msk.bf16.vlgmr.msra.gmra.mrb[44].mxu1 %vm826_vm3, %v1922_v39  ;;  %3891 = vmatprep.subr.bf16.mxu0 %v4167_v14 }
 0x172   : > { %3828 = vmatpush3.bf16.msra.mxu1 %v4051_v38  ;;  %3831 = vmatprep.mubr.msk.bf16.mxu1 %vm4168_vm2, %v4167_v14 }
 0x173   : > { %3829 = vmatprep.subr.bf16.mxu1 %v4167_v14 }
 0x176   : > { %3830 = vmatpush3.bf16.msra.mxu1 %v4052_v40 }
 0x177   : > { %3843 = vmatprep.subr.bf16.mxu1 %v4167_v14 }
 0x179   : > { %3832 = vmatmul.mubr.msk.bf16.vlgmr.msra.gmra.mrb[48].mxu1 %vm826_vm3, %v2046_v42 }
 0x17a   : > { %3844 = vmatpush3.bf16.msra.mxu1 %v4053_v41  ;;  %3847 = vmatprep.mubr.msk.bf16.mxu1 %vm4168_vm2, %v4167_v14 }
 0x17b   : > { %3845 = vmatprep.subr.bf16.mxu1 %v4167_v14 }
 0x17e   : > { %3846 = vmatpush3.bf16.msra.mxu1 %v4054_v43 }
 0x17f   : > { %3859 = vmatprep.subr.bf16.mxu1 %v4167_v14 }
 0x181   : > { %3848 = vmatmul.mubr.msk.bf16.vlgmr.msra.gmra.mrb[52].mxu1 %vm826_vm3, %v2170_v45 }
 0x182   : > { %3860 = vmatpush3.bf16.msra.mxu1 %v4055_v44  ;;  %3863 = vmatprep.mubr.msk.bf16.mxu1 %vm4168_vm2, %v4167_v14 }
 0x183   : > { %3861 = vmatprep.subr.bf16.mxu1 %v4167_v14 }
 0x186   : > { %3862 = vmatpush3.bf16.msra.mxu1 %v4056_v46 }
 0x187   : > { %3879 = vmatprep.subr.bf16.mxu1 %v4167_v14 }
 0x189   : > { %3864 = vmatmul.mubr.msk.bf16.vlgmr.msra.gmra.mrb[56].mxu1 %vm826_vm3, %v802_v49 }
 0x18a   : > { %3887 = vmatprep.mubr.msk.bf16.mxu1 %vm4168_vm2, %v4167_v14  ;;  %3880 = vmatpush3.bf16.msra.mxu1 %v4058_v47 }
 0x18b   : > { %3881 = vmatprep.subr.bf16.mxu1 %v4167_v14 }
 0x18e   : > { %3882 = vmatpush3.bf16.msra.mxu1 %v4060_v51 }
 0x18f   : > { %3883 = vmatprep.subr.bf16.mxu1 %v4167_v14 }
 0x192   : > { %3884 = vmatpush3.bf16.msra.mxu1 %v4062_v53 }
 0x193   : > { %3885 = vmatprep.subr.bf16.mxu1 %v4167_v14 }
 0x196   : > { %3886 = vmatpush3.bf16.msra.mxu1 %v4064_v55 }
 0x197   : > { %3899 = vmatprep.subr.bf16.mxu1 %v4167_v14 }
 0x1ec   : > { %v864_v56 = vpop.f32.mrb[0].mxu1  ;;  %v1166_v57 = vpop.f32.mrb[8].mxu0 }
 0x1ed   : > { %v3673_v58 = vpop.f32.mrb[1].mxu1  ;;  %v3713_v59 = vpop.f32.mrb[9].mxu0 }
 0x1ee   : > { %v867_v60 = vpop.f32.mrb[2].mxu1  ;;  %v1169_v61 = vpop.f32.mrb[10].mxu0 }
 0x1ef   : > { %v3674_v62 = vpop.f32.mrb[3].mxu1  ;;  %v3714_v63 = vpop.f32.mrb[11].mxu0 }
 0x1f4   : > { %v919_v0 = vpop.f32.mrb[4].mxu1  ;;  %v1290_v1 = vpop.f32.mrb[12].mxu0 }
 0x1f5   : > { %v920_v2 = vadd.f32 %v919_v0, %v864_v56  ;;  %v3681_v3 = vpop.f32.mrb[5].mxu1  ;;  %v3729_v4 = vpop.f32.mrb[13].mxu0 }
 0x1f6   : > { %v922_v5 = vpop.f32.mrb[6].mxu1  ;;  %v1293_v6 = vpop.f32.mrb[14].mxu0 }
 0x1f7   : > { %v3682_v7 = vpop.f32.mrb[7].mxu1  ;;  %v3730_v8 = vpop.f32.mrb[15].mxu0 }
 0x1fc   : > { %v980_v9 = vpop.f32.mrb[8].mxu1  ;;  %v1414_v10 = vpop.f32.mrb[16].mxu0 }
 0x1fd   : > { %v986_v11 = vadd.f32 %v980_v9, %v920_v2  ;;  %v3689_v12 = vpop.f32.mrb[9].mxu1  ;;  %v3745_v13 = vpop.f32.mrb[17].mxu0 }
 0x1fe   : > { %v983_v15 = vpop.f32.mrb[10].mxu1  ;;  %v1417_v16 = vpop.f32.mrb[18].mxu0 }
 0x1ff   : > { %v3690_v17 = vpop.f32.mrb[11].mxu1  ;;  %v3746_v18 = vpop.f32.mrb[19].mxu0 }
 0x204   : > { %v1042_v19 = vpop.f32.mrb[12].mxu1  ;;  %v1538_v20 = vpop.f32.mrb[20].mxu0 }
 0x205   : > { %v1048_v21 = vadd.f32 %v1042_v19, %v986_v11  ;;  %v3697_v22 = vpop.f32.mrb[13].mxu1  ;;  %v3761_v23 = vpop.f32.mrb[21].mxu0 }
 0x206   : > { %v1045_v24 = vpop.f32.mrb[14].mxu1  ;;  %v1541_v25 = vpop.f32.mrb[22].mxu0 }
 0x207   : > { %v3698_v26 = vpop.f32.mrb[15].mxu1  ;;  %v3762_v27 = vpop.f32.mrb[23].mxu0 }
 0x20c   : > { %v1104_v28 = vpop.f32.mrb[16].mxu1  ;;  %v1662_v29 = vpop.f32.mrb[24].mxu0 }
 0x20d   : > { %v1110_v31 = vadd.f32 %v1104_v28, %v1048_v21  ;;  %v3705_v32 = vpop.f32.mrb[17].mxu1  ;;  %v3777_v33 = vpop.f32.mrb[25].mxu0 }
 0x20e   : > { %v1107_v34 = vpop.f32.mrb[18].mxu1  ;;  %v1665_v36 = vpop.f32.mrb[26].mxu0 }
 0x20f   : > { %v3706_v30 = vpop.f32.mrb[19].mxu1  ;;  %v3778_v37 = vpop.f32.mrb[27].mxu0  ;;  %v1172_v38 = vadd.f32 %v1166_v57, %v1110_v31 }
 0x214   : > { %v1228_v39 = vpop.f32.mrb[20].mxu1  ;;  %v1786_v40 = vpop.f32.mrb[28].mxu0 }
 0x215   : > { %v1234_v41 = vadd.f32 %v1228_v39, %v1172_v38  ;;  %v3721_v42 = vpop.f32.mrb[21].mxu1  ;;  %v3793_v43 = vpop.f32.mrb[29].mxu0 }
 0x216   : > { %v1231_v44 = vpop.f32.mrb[22].mxu1  ;;  %v1789_v45 = vpop.f32.mrb[30].mxu0 }
 0x217   : > { %v3722_v46 = vpop.f32.mrb[23].mxu1  ;;  %v3794_v48 = vpop.f32.mrb[31].mxu0  ;;  %v1296_v49 = vadd.f32 %v1290_v1, %v1234_v41 }
 0x21c   : > { %v1351_v35 = vpop.f32.mrb[24].mxu1  ;;  %v1910_v47 = vpop.f32.mrb[32].mxu0 }
 0x21d   : > { %v1357_v50 = vadd.f32 %v1351_v35, %v1296_v49  ;;  %v3737_v51 = vpop.f32.mrb[25].mxu1  ;;  %v3809_v52 = vpop.f32.mrb[33].mxu0 }
 0x21e   : > { %v1354_v53 = vpop.f32.mrb[26].mxu1  ;;  %v1913_v54 = vpop.f32.mrb[34].mxu0 }
 0x21f   : > { %v3738_v55 = vpop.f32.mrb[27].mxu1  ;;  %v1420_v56 = vadd.f32 %v1414_v10, %v1357_v50  ;;  %v3810_v57 = vpop.f32.mrb[35].mxu0  ;;  %v3456_v50 = vld [vmem:[%s592_s21] ss:$0 sm:$0xff]  ;;  %s600_s21 = scalar_lea.vmem %s4720_s6, %s4295_s22 }
 0x220   : > { %v4065_v57 = vld [vmem:[%s4557_s15] sm:$0xff]  }
 0x224   : > { %v1476_v58 = vpop.f32.mrb[28].mxu1  ;;  %v2034_v59 = vpop.f32.mrb[36].mxu0 }
 0x225   : > { %v1482_v60 = vadd.f32 %v1476_v58, %v1420_v56  ;;  %v3753_v61 = vpop.f32.mrb[29].mxu1  ;;  %v3825_v62 = vpop.f32.mrb[37].mxu0 }
 0x226   : > { %v1479_v63 = vpop.f32.mrb[30].mxu1  ;;  %v2037_v0 = vpop.f32.mrb[38].mxu0  ;;  %v4068_v61 = vld [vmem:[%s4575_s16 + $0x8] sm:$0xff]   ;;  %v3457_v62 = vld [vmem:[%s600_s21] ss:$0 sm:$0xff]  ;;  %s616_s21 = scalar_lea.vmem %s4724_s10, %s4295_s22 }
 0x227   : > { %v3754_v2 = vpop.f32.mrb[31].mxu1  ;;  %v1544_v3 = vadd.f32 %v1538_v20, %v1482_v60  ;;  %v3826_v1 = vpop.f32.mrb[39].mxu0  ;;  %v4067_v60 = vld [vmem:[%s4557_s15 + $0x8] sm:$0xff]   ;;  %v3463_v63 = vld [vmem:[%s608_s30] ss:$0 sm:$0xff]  ;;  %s3268_s15 = sshll.u32 %s4295_s22, 3 }
 0x228   : > { %s4634_s30 = scalar_lea.vmem %s4726_s12, %s3268_s15  ;;  %s574_s22 = sand.u32 1, %s4157_s26  }
 0x229   : > { %s4673_s29 = scalar_lea.sflag [#allocation3], %s574_s22 }
 0x22c   : > { %v1600_v4 = vpop.f32.mrb[32].mxu1  ;;  %v2158_v5 = vpop.f32.mrb[40].mxu0 }
 0x22d   : > { %v1606_v6 = vadd.f32 %v1600_v4, %v1544_v3  ;;  %v3769_v7 = vpop.f32.mrb[33].mxu1  ;;  %v3841_v8 = vpop.f32.mrb[41].mxu0 }
 0x22e   : > { %v1603_v9 = vpop.f32.mrb[34].mxu1  ;;  %v2161_v11 = vpop.f32.mrb[42].mxu0 }
 0x22f   : > { %v3770_v12 = vpop.f32.mrb[35].mxu1  ;;  %v1668_v10 = vadd.f32 %v1662_v29, %v1606_v6  ;;  %v3842_v13 = vpop.f32.mrb[43].mxu0 }
 0x230   : > { %v4070_v13 = vld [vmem:[%s4575_s16 + $0x20] sm:$0xff]  }
 0x234   : > { %v1724_v15 = vpop.f32.mrb[36].mxu1  ;;  %v2282_v16 = vpop.f32.mrb[44].mxu0 }
 0x235   : > { %v1730_v17 = vadd.f32 %v1724_v15, %v1668_v10  ;;  %v3785_v18 = vpop.f32.mrb[37].mxu1  ;;  %v3857_v19 = vpop.f32.mrb[45].mxu0  ;;  %v4069_v10 = vld [vmem:[%s4575_s16 + $0x10] sm:$0xff]  }
 0x236   : > { %v1727_v21 = vpop.f32.mrb[38].mxu1  ;;  %v2285_v22 = vpop.f32.mrb[46].mxu0  ;;  %v4072_v18 = vld [vmem:[%s4575_s16 + $0x28] sm:$0xff]   ;;  %v4073_v19 = vld [vmem:[%s4575_s16 + $0x30] sm:$0xff]  }
 0x237   : > { %v3786_v23 = vpop.f32.mrb[39].mxu1  ;;  %v3858_v20 = vpop.f32.mrb[47].mxu0  ;;  %v1792_v24 = vadd.f32 %v1786_v40, %v1730_v17  ;;  %v4071_v17 = vld [vmem:[%s4575_s16 + $0x18] sm:$0xff]   ;;  %v4074_v21 = vld [vmem:[%s4575_s16 + $0x40] sm:$0xff]  }
 0x238   : > { %v4075_v22 = vld [vmem:[%s4575_s16 + $0x38] sm:$0xff]   ;;  %v4076_v23 = vld [vmem:[%s4575_s16 + $0x48] sm:$0xff]   ;;  %v4077_v20 = vld [vmem:[%s4575_s16 + $0x50] sm:$0xff]  }
 0x23c   : > { %v1847_v25 = vpop.f32.mrb[40].mxu1 }
 0x23d   : > { %v1853_v26 = vadd.f32 %v1847_v25, %v1792_v24  ;;  %v3801_v27 = vpop.f32.mrb[41].mxu1  ;;  %v4078_v24 = vld [vmem:[%s4575_s16 + $0x58] sm:$0xff]   ;;  %v3469_v25 = vld [vmem:[%s616_s21] ss:$0 sm:$0xff] }
 0x23e   : > { %v1850_v28 = vpop.f32.mrb[42].mxu1 }
 0x23f   : > { %v3802_v31 = vpop.f32.mrb[43].mxu1  ;;  %v1916_v32 = vadd.f32 %v1910_v47, %v1853_v26  ;;  %v3473_v26 = vld [vmem:[%s4634_s30] ss:$0 sm:$0xff] }
 0x244   : > { %v1972_v33 = vpop.f32.mrb[44].mxu1 }
 0x245   : > { %v1978_v34 = vadd.f32 %v1972_v33, %v1916_v32  ;;  %v3817_v29 = vpop.f32.mrb[45].mxu1 }
 0x246   : > { %v1975_v36 = vpop.f32.mrb[46].mxu1 }
 0x247   : > { %v3818_v30 = vpop.f32.mrb[47].mxu1  ;;  %v2040_v37 = vadd.f32 %v2034_v59, %v1978_v34  ;;  %v4066_v59 = vld [vmem:[%s4575_s16] sm:$0xff]   ;;  %s3948_s16 = smul.u32 12, %s574_s22 }
 0x249   : > { %s576_s15 = scalar_lea.vmem [#allocation2], %s3948_s16  ;;  %s4169_s16 = smov [#allocation2]  }
 0x24a   : > { %s3076_s20 = sshll.u32 %s576_s15, 4  ;;  %s4107_s21 = sshll.u32 %s4169_s16, 4  ;;  %s4668_s20 = int_to_ptr.vmem [resolvable:$true] %s3076_s20  ;;  %s4108_s21 = int_to_ptr.vmem [resolvable:$false] %s4107_s21 }
 0x24b   : > { %s4109_s17 = scalar_lea.vmem %s4108_s21, 384  ;;  %p4110_p0 = scmp.lt.s32.totalorder %s4668_s20, %s4108_s21 }
 0x24c   : > { %v2096_v38 = vpop.f32.mrb[48].mxu1 }
 0x24d   : > { %v2102_v39 = vadd.f32 %v2096_v38, %v2040_v37  ;;  %v3833_v41 = vpop.f32.mrb[49].mxu1  ;;  %v3481_v38 = vld [vmem:[%s4634_s30 + $0x1] ss:$0 sm:$0xff] }
 0x24e   : > { %v2099_v42 = vpop.f32.mrb[50].mxu1 }
 0x24f   : > { %v3834_v43 = vpop.f32.mrb[51].mxu1  ;;  %v2164_v44 = vadd.f32 %v2158_v5, %v2102_v39  ;;  %v3489_v39 = vld [vmem:[%s4634_s30 + $0x2] ss:$0 sm:$0xff] }
 0x254   : > { %v2220_v40 = vpop.f32.mrb[52].mxu1 }
 0x255   : > { %v2226_v45 = vadd.f32 %v2220_v40, %v2164_v44  ;;  %v3849_v46 = vpop.f32.mrb[53].mxu1 }
 0x256   : > { %v2223_v48 = vpop.f32.mrb[54].mxu1 }
 0x257   : > { %v3850_v49 = vpop.f32.mrb[55].mxu1  ;;  %v2288_v35 = vadd.f32 %v2282_v16, %v2226_v45 }
 0x25c   : > { %v2343_v47 = vpop.f32.mrb[56].mxu1 }
 0x25d   : > { %v2349_v51 = vadd.f32 %v2343_v47, %v2288_v35  ;;  %v3865_v52 = vpop.f32.mrb[57].mxu1 }
 0x25e   : > { %v2346_v53 = vpop.f32.mrb[58].mxu1 }
 0x25f   : > { %v2357_v54 = vadd.f32 %v3456_v50, %v2349_v51  ;;  %v3866_v55 = vpop.f32.mrb[59].mxu1  ;;  %v3497_v53 = vld [vmem:[%s4634_s30 + $0x3] ss:$0 sm:$0xff] }
 0x261   : > { %v2358_v56 = vmax.f32 %v2357_v54, 0.0  ;;  %v3505_v54 = vld [vmem:[%s4634_s30 + $0x4] ss:$0 sm:$0xff] }
 0x263   : > { %v2359_v58 = vpack.c.bf16 %v2358_v56, %v2358_v56 }
 0x265   : > { %3876 = vmatmul.mubr.msk.bf16.vlgmr.msra.gmra.mrb[48].mxu0 %vm2399_vm4, %v2359_v58  ;;  %3888 = vmatmul.mubr.msk.bf16.vlgmr.msra.gmra.mrb[60].mxu1 %vm2399_vm4, %v2359_v58 }
 0x266   : > { %3892 = vmatpush3.bf16.msra.mxu0 %v4065_v57  ;;  %3895 = vmatprep.mubr.msk.bf16.mxu0 %vm4168_vm2, %v4167_v14 }
 0x267   : > { %3893 = vmatprep.subr.bf16.mxu0 %v4167_v14  ;;  %3903 = vmatprep.mubr.msk.bf16.mxu1 %vm4168_vm2, %v4167_v14 }
 0x268   : > { %3900 = vmatpush3.bf16.msra.mxu1 %v4066_v59 }
 0x269   : > { %3901 = vmatprep.subr.bf16.mxu1 %v4167_v14 }
 0x26a   : > { %3894 = vmatpush3.bf16.msra.mxu0 %v4067_v60 }
 0x26b   : > { %3907 = vmatprep.subr.bf16.mxu0 %v4167_v14 }
 0x26c   : > { %3902 = vmatpush3.bf16.msra.mxu1 %v4068_v61 }
 0x26d   : > { %3915 = vmatprep.subr.bf16.mxu1 %v4167_v14 }
 0x338   : > { %v2437_v0 = vpop.f32.mrb[48].mxu0  ;;  %v2518_v2 = vpop.f32.mrb[60].mxu1 }
 0x339   : > { %v2438_v3 = vadd.f32 %v3457_v62, %v2437_v0  ;;  %v2519_v1 = vadd.f32 %v3463_v63, %v2518_v2  ;;  %v3877_v4 = vpop.f32.mrb[49].mxu0  ;;  %v3889_v5 = vpop.f32.mrb[61].mxu1 }
 0x33a   : > { %v2440_v6 = vpop.f32.mrb[50].mxu0  ;;  %v2521_v7 = vpop.f32.mrb[62].mxu1  ;;  %v3513_v5 = vld [vmem:[%s4634_s30 + $0x5] ss:$0 sm:$0xff]  ;;  %s4103_s30 = scalar_lea.vmem %s4668_s20, 192 }
 0x33b   : > { %v2443_v8 = vmax.f32 %v2438_v3, 0.0  ;;  %v2524_v9 = vmax.f32 %v2519_v1, 0.0  ;;  %v3878_v11 = vpop.f32.mrb[51].mxu0  ;;  %v3890_v12 = vpop.f32.mrb[63].mxu1  ;;  %p4104_p11 = scmp.ne.s32.totalorder %s4668_s20, %s4103_s30  ;;  %p4111_p1 = scmp.lt.s32.totalorder %s4109_s17, %s4103_s30 }
 0x33d   : > { %v2444_v15 = vpack.c.bf16 %v2443_v8, %v2443_v8  ;;  %v2525_v16 = vpack.c.bf16 %v2524_v9, %v2524_v9  ;;  %p4105_p12 = pnand %p4104_p11, %p4280_p5  ;;  %p4112_p2 = por %p4111_p1, %p4110_p0 }
 0x33f   : > { %3896 = vmatmul.mubr.msk.bf16.vlgmr.msra.gmra.mrb[52].mxu0 %vm826_vm3, %v2444_v15  ;;  %3904 = vmatmul.mubr.msk.bf16.vlgmr.msra.gmra.mrb[64].mxu1 %vm826_vm3, %v2525_v16  ;;  %p4106_p13 = pneg %p4105_p12 }
 0x340   : > { %3908 = vmatpush3.bf16.msra.mxu0 %v4069_v10  ;;  %3916 = vmatpush3.bf16.msra.mxu1 %v4070_v13 }
 0x341   : > { %3909 = vmatprep.subr.bf16.mxu0 %v4167_v14  ;;  %3917 = vmatprep.subr.bf16.mxu1 %v4167_v14  ;;  %p4113_p3 = pnand %p4112_p2, %p4106_p13 }
 0x342   : > { %3911 = vmatprep.mubr.msk.bf16.mxu0 %vm4168_vm2, %v4167_v14  ;;  %3919 = vmatprep.mubr.msk.bf16.mxu1 %vm4168_vm2, %v4167_v14 }
 0x344   : > { %3910 = vmatpush3.bf16.msra.mxu0 %v4071_v17  ;;  %3918 = vmatpush3.bf16.msra.mxu1 %v4072_v18 }
 0x345   : > { %3923 = vmatprep.subr.bf16.mxu0 %v4167_v14  ;;  %3931 = vmatprep.subr.bf16.mxu1 %v4167_v14 }
 0x347   : > { %3912 = vmatmul.mubr.msk.bf16.vlgmr.msra.gmra.mrb[56].mxu0 %vm826_vm3, %v2525_v16  ;;  %3920 = vmatmul.mubr.msk.bf16.vlgmr.msra.gmra.mrb[68].mxu1 %vm826_vm3, %v2525_v16 }
 0x348   : > { %3924 = vmatpush3.bf16.msra.mxu0 %v4073_v19  ;;  %3932 = vmatpush3.bf16.msra.mxu1 %v4074_v21 }
 0x349   : > { %3925 = vmatprep.subr.bf16.mxu0 %v4167_v14  ;;  %3933 = vmatprep.subr.bf16.mxu1 %v4167_v14 }
 0x34a   : > { %3927 = vmatprep.mubr.msk.bf16.mxu0 %vm4168_vm2, %v4167_v14  ;;  %3935 = vmatprep.mubr.msk.bf16.mxu1 %vm4168_vm2, %v4167_v14 }
 0x34c   : > { %3926 = vmatpush3.bf16.msra.mxu0 %v4075_v22  ;;  %3934 = vmatpush3.bf16.msra.mxu1 %v4076_v23 }
 0x34d   : > { %3939 = vmatprep.subr.bf16.mxu0 %v4167_v14 }
 0x34f   : > { %3928 = vmatmul.mubr.msk.bf16.vlgmr.msra.gmra.mrb[60].mxu0 %vm826_vm3, %v2525_v16  ;;  %3936 = vmatmul.mubr.msk.bf16.vlgmr.msra.gmra.mrb[72].mxu1 %vm826_vm3, %v2525_v16 }
 0x350   : > { %3940 = vmatpush3.bf16.msra.mxu0 %v4077_v20  ;;  %3943 = vmatprep.mubr.msk.bf16.mxu0 %vm4168_vm2, %v4167_v14 }
 0x351   : > { %3941 = vmatprep.subr.bf16.mxu0 %v4167_v14 }
 0x354   : > { %3942 = vmatpush3.bf16.msra.mxu0 %v4078_v24 }
 0x357   : > { %3944 = vmatmul.mubr.msk.bf16.vlgmr.msra.gmra.mrb[64].mxu0 %vm826_vm3, %v2525_v16 }
 0x412   : > { %v2586_v27 = vpop.f32.mrb[52].mxu0  ;;  %v2650_v14 = vpop.f32.mrb[64].mxu1 }
 0x413   : > { %v2587_v28 = vadd.f32 %v3469_v25, %v2586_v27  ;;  %v2651_v31 = vadd.f32 %v3473_v26, %v2650_v14  ;;  %v3897_v32 = vpop.f32.mrb[53].mxu0  ;;  %v3905_v33 = vpop.f32.mrb[65].mxu1 }
 0x414   : > { %v2589_v34 = vpop.f32.mrb[54].mxu0  ;;  %v2653_v29 = vpop.f32.mrb[66].mxu1 }
 0x415   : > { %v2972_v36 = vadd.f32 %v2651_v31, %v2587_v28  ;;  %v3898_v30 = vpop.f32.mrb[55].mxu0  ;;  %v3906_v37 = vpop.f32.mrb[67].mxu1 }
 0x41a   : > { %v2712_v41 = vpop.f32.mrb[56].mxu0  ;;  %v2774_v42 = vpop.f32.mrb[68].mxu1 }
 0x41b   : > { %v2713_v43 = vadd.f32 %v3481_v38, %v2712_v41  ;;  %v2775_v44 = vadd.f32 %v3489_v39, %v2774_v42  ;;  %v3913_v40 = vpop.f32.mrb[57].mxu0  ;;  %v3921_v45 = vpop.f32.mrb[69].mxu1 }
 0x41c   : > { %v2715_v46 = vpop.f32.mrb[58].mxu0  ;;  %v2777_v48 = vpop.f32.mrb[70].mxu1 }
 0x41d   : > { %v2966_v49 = vadd.f32 %v2713_v43, %v2651_v31  ;;  %v2987_v35 = vadd.f32 %v2713_v43, %v2587_v28  ;;  %v3002_v47 = vadd.f32 %v2775_v44, %v2587_v28  ;;  %v3914_v50 = vpop.f32.mrb[59].mxu0  ;;  %v3922_v51 = vpop.f32.mrb[71].mxu1 }
 0x41f   : > { %v2967_v52 = vadd.f32 %v2966_v49, %v2775_v44 }
 0x422   : > { %v2836_v55 = vpop.f32.mrb[60].mxu0  ;;  %v2898_v56 = vpop.f32.mrb[72].mxu1 }
 0x423   : > { %v2837_v57 = vadd.f32 %v3497_v53, %v2836_v55  ;;  %v2899_v58 = vadd.f32 %v3505_v54, %v2898_v56  ;;  %v3929_v59 = vpop.f32.mrb[61].mxu0  ;;  %v3937_v60 = vpop.f32.mrb[73].mxu1 }
 0x424   : > { %v2839_v61 = vpop.f32.mrb[62].mxu0  ;;  %v2901_v62 = vpop.f32.mrb[74].mxu1 }
 0x425   : > { %v2968_v63 = vadd.f32 %v2967_v52, %v2837_v57  ;;  %v3017_v0 = vadd.f32 %v2837_v57, %v2587_v28  ;;  %v3032_v2 = vadd.f32 %v2899_v58, %v2587_v28  ;;  %v3930_v3 = vpop.f32.mrb[63].mxu0  ;;  %v3938_v1 = vpop.f32.mrb[75].mxu1 }
 0x427   : > { %v2969_v4 = vadd.f32 %v2968_v63, %v2899_v58 }
 0x42a   : > { %v2960_v6 = vpop.f32.mrb[64].mxu0 }
 0x42b   : > { %v2961_v7 = vadd.f32 %v3513_v5, %v2960_v6  ;;  %v3945_v8 = vpop.f32.mrb[65].mxu0 }
 0x42c   : > { %v2963_v9 = vpop.f32.mrb[66].mxu0 }
 0x42d   : > { %v2970_v11 = vadd.f32 %v2969_v4, %v2961_v7  ;;  %v3047_v12 = vadd.f32 %v2961_v7, %v2587_v28  ;;  %v3946_v10 = vpop.f32.mrb[67].mxu0 }
 0x42f   : > { %v2971_v13 = vmul.f32 0.16666667, %v2970_v11 }
 0x431   : > { %v3003_v15 = vsub.f32 %v3002_v47, %v2971_v13  ;;  %v2973_v16 = vsub.f32 %v2972_v36, %v2971_v13  ;;  %v3018_v17 = vsub.f32 %v3017_v0, %v2971_v13  ;;  %v2988_v18 = vsub.f32 %v2987_v35, %v2971_v13 }
 0x432   : > { %v3048_v19 = vsub.f32 %v3047_v12, %v2971_v13  ;;  %v3033_v21 = vsub.f32 %v3032_v2, %v2971_v13 }
 0x433   : > { %v3004_v22 = vsel %vm2974_vm5, %v3003_v15, -inf  ;;  %v2975_v23 = vsel %vm2974_vm5, %v2973_v16, -inf  ;;  %v3019_v20 = vsel %vm2974_vm5, %v3018_v17, -inf  ;;  %v2989_v24 = vsel %vm2974_vm5, %v2988_v18, -inf }
 0x434   : > { %3005 = vmax.xlane.f32.xlu1 %v3004_v22  ;;  %2976 = vmax.xlane.f32.xlu0 %v2975_v23  ;;  %v3049_v25 = vsel %vm2974_vm5, %v3048_v19, -inf  ;;  %v3034_v26 = vsel %vm2974_vm5, %v3033_v21, -inf }
 0x438   : > { %3020 = vmax.xlane.f32.xlu1 %v3019_v20  ;;  %2990 = vmax.xlane.f32.xlu0 %v2989_v24 }
 0x43c   : > { %3050 = vmax.xlane.f32.xlu1 %v3049_v25  ;;  %3035 = vmax.xlane.f32.xlu0 %v3034_v26 }
 0x4c1   : > { %v3006_v27 = vpop.xlane.xlu1 %3005  ;;  %v2977_v14 = vpop.xlane.xlu0 %2976 }
 0x4c2   : > { %v3007_v28 = vsub.f32 %v3003_v15, %v3006_v27  ;;  %v2978_v31 = vsub.f32 %v2973_v16, %v2977_v14 }
 0x4c4   : > { %v2979_v32 = vmul.f32 1.442695, %v2978_v31  ;;  %v3008_v33 = vmul.f32 1.442695, %v3007_v28 }
 0x4c5   : > { %v3021_v34 = vpop.xlane.xlu1 %3020  ;;  %v2991_v29 = vpop.xlane.xlu0 %2990 }
 0x4c6   : > { %v3022_v36 = vsub.f32 %v3018_v17, %v3021_v34  ;;  %v2992_v30 = vsub.f32 %v2988_v18, %v2991_v29  ;;  %4079 = vpow2.f32 %v2979_v32 }
 0x4c7   : > { %4081 = vpow2.f32 %v3008_v33 }
 0x4c8   : > { %v2993_v37 = vmul.f32 1.442695, %v2992_v30  ;;  %v3023_v38 = vmul.f32 1.442695, %v3022_v36 }
 0x4c9   : > { %v3051_v39 = vpop.xlane.xlu1 %3050  ;;  %v3036_v41 = vpop.xlane.xlu0 %3035 }
 0x4ca   : > { %v3052_v42 = vsub.f32 %v3048_v19, %v3051_v39  ;;  %v3037_v43 = vsub.f32 %v3033_v21, %v3036_v41  ;;  %4083 = vpow2.f32 %v2993_v37 }
 0x4cb   : > { %4085 = vpow2.f32 %v3023_v38 }
 0x4cc   : > { %v3038_v44 = vmul.f32 1.442695, %v3037_v43  ;;  %v3053_v40 = vmul.f32 1.442695, %v3052_v42 }
 0x4ce   : > { %4087 = vpow2.f32 %v3038_v44 }
 0x4cf   : > { %4089 = vpow2.f32 %v3053_v40 }
 0x4d0   : > { %v4080_v45 = vpop.eup %4079 }
 0x4d1   : > { %v2981_v46 = vsel %vm2974_vm5, %v4080_v45, 0.0  ;;  %v4082_v48 = vpop.eup %4081 }
 0x4d2   : > { %2982 = vadd.xlane.f32.xlu0 %v2981_v46  ;;  %v3010_v35 = vsel %vm2974_vm5, %v4082_v48, 0.0 }
 0x4d4   : > { %v4084_v49 = vpop.eup %4083 }
 0x4d5   : > { %v2995_v47 = vsel %vm2974_vm5, %v4084_v49, 0.0  ;;  %v4086_v50 = vpop.eup %4085 }
 0x4d6   : > { %3011 = vadd.xlane.f32.xlu0 %v3010_v35  ;;  %2996 = vadd.xlane.f32.xlu1 %v2995_v47  ;;  %v3025_v52 = vsel %vm2974_vm5, %v4086_v50, 0.0 }
 0x4d8   : > { %v4088_v51 = vpop.eup %4087 }
 0x4d9   : > { %v3040_v53 = vsel %vm2974_vm5, %v4088_v51, 0.0  ;;  %v4090_v54 = vpop.eup %4089 }
 0x4da   : > { %3026 = vadd.xlane.f32.xlu1 %v3025_v52  ;;  %3041 = vadd.xlane.f32.xlu0 %v3040_v53  ;;  %v3055_v55 = vsel %vm2974_vm5, %v4090_v54, 0.0 }
 0x4de   : > { %3056 = vadd.xlane.f32.xlu1 %v3055_v55 }
 0x55f   : > { %v2983_v56 = vpop.xlane.xlu0 %2982 }
 0x560   : > { %4091 = vrcp.f32 %v2983_v56 }
 0x563   : > { %v2997_v57 = vpop.xlane.xlu1 %2996  ;;  %v3012_v58 = vpop.xlane.xlu0 %3011 }
 0x564   : > { %4093 = vrcp.f32 %v2997_v57 }
 0x565   : > { %4095 = vrcp.f32 %v3012_v58 }
 0x567   : > { %v3027_v59 = vpop.xlane.xlu1 %3026  ;;  %v3042_v60 = vpop.xlane.xlu0 %3041 }
 0x568   : > { %4097 = vrcp.f32 %v3027_v59 }
 0x569   : > { %4099 = vrcp.f32 %v3042_v60 }
 0x56a   : > { %v4092_v61 = vpop.eup %4091 }
 0x56b   : > { %v2985_v62 = vmul.f32 %v4092_v61, %v4080_v45  ;;  %v3057_v63 = vpop.xlane.xlu1 %3056 }
 0x56c   : > { %4101 = vrcp.f32 %v3057_v63 }
 0x56d   : > { %2986 = vst.msk [vmem:[%s576_s15] sm:$0x3] %vm2974_vm5, %v2985_v62 }
 0x56e   : > { %v4094_v0 = vpop.eup %4093 }
 0x56f   : > { %v4096_v2 = vpop.eup %4095  ;;  %v2999_v3 = vmul.f32 %v4094_v0, %v4084_v49 }
 0x570   : > { %v3014_v1 = vmul.f32 %v4096_v2, %v4082_v48 }
 0x571   : > { %3517 = vst.msk [vmem:[%s576_s15 + $0x2] sm:$0x3] %vm2974_vm5, %v2999_v3 }
 0x572   : > { %v4098_v4 = vpop.eup %4097  ;;  %3518 = vst.msk [vmem:[%s576_s15 + $0x4] sm:$0x3] %vm2974_vm5, %v3014_v1 }
 0x573   : > { %v4100_v5 = vpop.eup %4099  ;;  %v3029_v6 = vmul.f32 %v4098_v4, %v4086_v50 }
 0x574   : > { %v3044_v7 = vmul.f32 %v4100_v5, %v4088_v51 }
 0x575   : > { %3519 = vst.msk [vmem:[%s576_s15 + $0x6] sm:$0x3] %vm2974_vm5, %v3029_v6 }
 0x576   : > { %v4102_v8 = vpop.eup %4101  ;;  %3520 = vst.msk [vmem:[%s576_s15 + $0x8] sm:$0x3] %vm2974_vm5, %v3044_v7 }
 0x577   : > { %v3059_v9 = vmul.f32 %v4102_v8, %v4090_v54 }
 0x579   : > { %3521 = vst.msk [vmem:[%s576_s15 + $0xa] sm:$0x3] %vm2974_vm5, %v3059_v9 }
 0x57a   : > { %4116 = shalt.err (!%p4113_p3)
}
 0x57b   : > { %s4117_s22 = scalar_lea.hbm %s4666_s24, 192  ;;  %s4121_s16 = scalar_lea.hbm %s4727_s13, 384 }
 0x57c   : > { %p4118_p4 = scmp.ne.s32.totalorder %s4666_s24, %s4117_s22  ;;  %p4122_p9 = scmp.lt.u32.totalorder %s4666_s24, %s4727_s13 }
 0x57d   : > { %p4123_p10 = scmp.lt.u32.totalorder %s4121_s16, %s4117_s22  ;;  %p4125_p12 = scmp.lt.u32.totalorder %s4117_s22, %s4666_s24 }
 0x57e   : > { %p4119_p7 = pnand %p4118_p4, %p4280_p5 }
 0x57f   : > { %p4124_p11 = por %p4123_p10, %p4122_p9 }
 0x580   : > { %p4120_p8 = pneg %p4119_p7 }
 0x581   : > { %p4126_p13 = por %p4125_p12, %p4124_p11 }
 0x583   : > { %p4127_p0 = pnand %p4126_p13, %p4120_p8 }
 0x585   : > { %4130 = shalt.err (!%p4127_p0)
}
 0x586   : > { %s4170_s30 = smov 32   ;;  %s4171_s17 = smov 2  }
 0x587   : > { %3953 = dma.vmem_to_hbm [thread:$0]  (%p4280_p5), %s4668_s20, 192, %s4666_s24, %s4673_s29, %s4170_s30, %s4170_s30, %s4171_s17  }
 0x588 PF: > { %p3959_p1 = scmp.ge.s32.totalorder %s4165_s28, 2  ;;  %s3091_s0 = sand.u32 1, %s4153_s25  }
 0x589   : > { %s3092_s22 = scalar_lea.sflag [#allocation3], %s3091_s0 }
 0x58a   : > { %p3956_p2 = pnand %p3959_p1, %p4284_p6 }
 0x58c   : > { %4148 = dma.done.wait (!%p3956_p2), %s3092_s22, 192  }
 0x58d   : > { %4150 = vsyncadd (!%p3956_p2), %s3092_s22, 4294967104  ;;  %s4733_s15 = sld [smem:[#allocation5_spill]]  ;;  %p23_p3 = scmp.ge.s32.totalorder %s4267_s14, 4  }
 0x58e   : > { %s4734_s25 = smov %s4157_s26  ;;  %s4735_s26 = smov %s4161_s27 }
 0x58f   : > { %s4737_s28 = smov %s4267_s14  ;;  %25 = sbr.rel (!%p23_p3) target bundleno = 5 (0x5), region = 174 }
 0x593   : > { %s4736_s27 = smov %s4733_s15 }
 0x596   :  { %3097 = vsyncpa [#allocation3], 1 }
 0x597   :  { %3099 = vsyncpa [#allocation3 + $0x1], 1 }

</bundles_post_ra>
